<compile_context>
chip_gen: v6e
topology: v6e:2x2x1
jax: 0.10.0
libtpu: 0.0.40
codegen_flags: <defaults>
</compile_context>

<pallas_src>
import functools

import jax
import jax.numpy as jnp
import numpy as np
from jax.experimental import pallas as pl
from jax.experimental.pallas import tpu as pltpu


# --------------------- fused pool + 3x(conv3x3+BN+ReLU) kernel ----------------

def _fused_down_block_kernel(x_ref, w1_ref, b1_ref, w2_ref, b2_ref, w3_ref,
                             b3_ref, o_ref, padA, padB, *,
                             down_size, Ho, Wo, Cin, Cout):
    HW = Ho * Wo

    # Zero the padded scratches: their borders provide the SAME-padding zeros for
    # every conv layer (interiors are fully overwritten below).
    padA[...] = jnp.zeros_like(padA)
    padB[...] = jnp.zeros_like(padB)

    # ------------------------- fused 2x2 max-pool -----------------------------
    if down_size:
        v = x_ref[0]                                        # (2*Ho, Wo, 2*Cin)
        m = jnp.maximum(v[:, :, :Cin], v[:, :, Cin:])       # max over W pairs
        m = m.reshape(Ho, 2, Wo, Cin)                       # split leading dim (free)
        pooled = jnp.maximum(m[:, 0], m[:, 1])              # max over H pairs
    else:
        pooled = x_ref[0]                                   # (Ho, Wo, Cin)

    padA[1:Ho + 1, 1:Wo + 1, :] = pooled                    # zero-padded layer-1 input

    # ---------------- conv3x3 + folded-BN bias + ReLU (in-kernel im2col) ------
    def conv_bn_relu(p_ref, c_in, w_ref, b_ref):
        # p_ref: (Ho+2, Wo+2, c_in) zero-padded activation in VMEM
        # w_ref: (9, c_in, Cout) bf16, BN scale already folded in
        acc = jnp.zeros((HW, Cout), jnp.float32)
        for t, (dh, dw) in enumerate((i, j) for i in range(3) for j in range(3)):
            tap = p_ref[dh:dh + Ho, dw:dw + Wo, :].reshape(HW, c_in)
            acc = acc + jnp.dot(tap.astype(jnp.bfloat16), w_ref[t],
                                preferred_element_type=jnp.float32)
        return jnp.maximum(acc + b_ref[...], 0.0)           # folded-BN bias + ReLU

    y = conv_bn_relu(padA, Cin, w1_ref, b1_ref)             # layer 1
    padB[1:Ho + 1, 1:Wo + 1, :] = y.reshape(Ho, Wo, Cout)   # stays in VMEM
    y = conv_bn_relu(padB, Cout, w2_ref, b2_ref)            # layer 2
    padB[1:Ho + 1, 1:Wo + 1, :] = y.reshape(Ho, Wo, Cout)   # stays in VMEM
    y = conv_bn_relu(padB, Cout, w3_ref, b3_ref)            # layer 3
    o_ref[0] = y.astype(o_ref.dtype)


# ----------------------------- parameter setup --------------------------------

def init_layer_params(key, cin, cout):
    ks = jax.random.split(key, 6)
    return dict(
        w=0.1 * jax.random.normal(ks[0], (cout, cin, 3, 3), jnp.float32),  # OIHW
        b=0.1 * jax.random.normal(ks[1], (cout,), jnp.float32),
        gamma=1.0 + 0.1 * jax.random.normal(ks[2], (cout,), jnp.float32),
        beta=0.1 * jax.random.normal(ks[3], (cout,), jnp.float32),
        mean=0.1 * jax.random.normal(ks[4], (cout,), jnp.float32),
        var=1.0 + 0.1 * jnp.abs(jax.random.normal(ks[5], (cout,), jnp.float32)),
    )


def fold_params(p, eps=1e-5):
    """Fold inference-mode BN into the conv weights/bias; weights -> (9,Cin,Cout) bf16."""
    s = p["gamma"] / jnp.sqrt(p["var"] + eps)                 # (Cout,)
    bias = (p["b"] - p["mean"]) * s + p["beta"]               # (Cout,)
    w_hwio = jnp.transpose(p["w"], (2, 3, 1, 0))              # OIHW -> HWIO
    cin, cout = w_hwio.shape[2], w_hwio.shape[3]
    w9 = (w_hwio.reshape(9, cin, cout) * s[None, None, :]).astype(jnp.bfloat16)
    return w9, bias.reshape(1, cout).astype(jnp.float32)


# ------------------------------ UNet_down_block -------------------------------

def unet_down_block(x_nchw, params, down_size):
    N, Cin, H, W = x_nchw.shape
    Cout = params[0]["w"].shape[0]

    x = jnp.transpose(x_nchw, (0, 2, 3, 1))                   # NCHW -> NHWC
    if down_size:
        assert H % 2 == 0 and W % 2 == 0, "2x2 max-pool assumes even H, W"
        Ho, Wo = H // 2, W // 2
        # Free row-major reshape: pairs W-neighbours on the lane axis so the
        # in-kernel pool needs no strided loads.
        x_in = x.reshape(N, H, Wo, 2 * Cin)
        in_block = (1, H, Wo, 2 * Cin)
    else:
        Ho, Wo = H, W
        x_in = x
        in_block = (1, Ho, Wo, Cin)
    HW = Ho * Wo

    (w1, b1), (w2, b2), (w3, b3) = (fold_params(p) for p in params)

    kernel = functools.partial(_fused_down_block_kernel, down_size=down_size,
                               Ho=Ho, Wo=Wo, Cin=Cin, Cout=Cout)

    out = pl.pallas_call(
        kernel,
        out_shape=jax.ShapeDtypeStruct((N, HW, Cout), jnp.float32),
        grid=(N,),
        in_specs=[
            pl.BlockSpec(in_block, lambda n: (n, 0, 0, 0)),
            pl.BlockSpec(w1.shape, lambda n: (0, 0, 0)),
            pl.BlockSpec(b1.shape, lambda n: (0, 0)),
            pl.BlockSpec(w2.shape, lambda n: (0, 0, 0)),
            pl.BlockSpec(b2.shape, lambda n: (0, 0)),
            pl.BlockSpec(w3.shape, lambda n: (0, 0, 0)),
            pl.BlockSpec(b3.shape, lambda n: (0, 0)),
        ],
        out_specs=pl.BlockSpec((1, HW, Cout), lambda n: (n, 0, 0)),
        scratch_shapes=[
            pltpu.VMEM((Ho + 2, Wo + 2, Cin), jnp.float32),   # padded layer-1 input
            pltpu.VMEM((Ho + 2, Wo + 2, Cout), jnp.float32),  # padded inter-layer act
        ],
        compiler_params=pltpu.CompilerParams(dimension_semantics=("parallel",)),
    )(x_in, w1, b1, w2, b2, w3, b3)

    out = out.reshape(N, Ho, Wo, Cout)
    return jnp.transpose(out, (0, 3, 1, 2))                   # NHWC -> NCHW


# ------------------------------ pure-JAX reference ----------------------------

def reference(x_nchw, params, down_size, eps=1e-5):
    x = x_nchw
    if down_size:
        x = jax.lax.reduce_window(x, -jnp.inf, jax.lax.max,
                                  (1, 1, 2, 2), (1, 1, 2, 2), "VALID")
    for p in params:
        y = jax.lax.conv_general_dilated(
            x, p["w"], (1, 1), "SAME",
            dimension_numbers=("NCHW", "OIHW", "NCHW"))
        y = y + p["b"][None, :, None, None]
        y = (y - p["mean"][None, :, None, None]) / jnp.sqrt(
            p["var"][None, :, None, None] + eps)
        y = y * p["gamma"][None, :, None, None] + p["beta"][None, :, None, None]
        x = jnp.maximum(y, 0.0)
    return x


# ----------------------------------- main --------------------------------------

if __name__ == "__main__":
    key = jax.random.PRNGKey(0)
    kx, k1, k2, k3 = jax.random.split(key, 4)

    N, Cin, H, W = 2, 4, 16, 16
    Cout = 8
    down_size = True

    x = jax.random.normal(kx, (N, Cin, H, W), jnp.float32)
    params = [
        init_layer_params(k1, Cin, Cout),
        init_layer_params(k2, Cout, Cout),
        init_layer_params(k3, Cout, Cout),
    ]

    out = jax.block_until_ready(unet_down_block(x, params, down_size))
    ref = jax.block_until_ready(reference(x, params, down_size))

    assert out.shape == ref.shape, (out.shape, ref.shape)
    # bf16 matmul operands (f32 accumulation) -> slightly looser tolerances.
    if not np.allclose(np.asarray(out), np.asarray(ref), atol=5e-2, rtol=5e-2):
        raise AssertionError("Pallas output mismatch vs JAX reference")

    print("KERNEL_OK")
</pallas_src>

<mosaic_0001>
module attributes {stable_mosaic.version = 11 : i64} {
  func.func @_fused_down_block_kernel(%arg0: i32, %arg1: memref<1x16x8x8xf32, #tpu.memory_space<vmem>>, %arg2: memref<9x4x8xbf16, #tpu.memory_space<vmem>>, %arg3: memref<1x8xf32, #tpu.memory_space<vmem>>, %arg4: memref<9x8x8xbf16, #tpu.memory_space<vmem>>, %arg5: memref<1x8xf32, #tpu.memory_space<vmem>>, %arg6: memref<9x8x8xbf16, #tpu.memory_space<vmem>>, %arg7: memref<1x8xf32, #tpu.memory_space<vmem>>, %arg8: memref<1x64x8xf32, #tpu.memory_space<vmem>>, %arg9: memref<10x10x4xf32, #tpu.memory_space<vmem>>, %arg10: memref<10x10x8xf32, #tpu.memory_space<vmem>>) attributes {dimension_semantics = [#tpu.dimension_semantics<parallel>], iteration_bounds = array<i64: 2>, scalar_prefetch = 0 : i64, scratch_operands = 2 : i64, tpu.core_type = #tpu.core_type<tc>, window_params = [{transform_indices = @transform_0, window_bounds = array<i64: 1, 16, 8, 8>}, {pipeline_mode = #tpu.pipeline_mode<synchronous>, transform_indices = @transform_1, window_bounds = array<i64: 9, 4, 8>}, {pipeline_mode = #tpu.pipeline_mode<synchronous>, transform_indices = @transform_2, window_bounds = array<i64: 1, 8>}, {pipeline_mode = #tpu.pipeline_mode<synchronous>, transform_indices = @transform_3, window_bounds = array<i64: 9, 8, 8>}, {pipeline_mode = #tpu.pipeline_mode<synchronous>, transform_indices = @transform_4, window_bounds = array<i64: 1, 8>}, {pipeline_mode = #tpu.pipeline_mode<synchronous>, transform_indices = @transform_5, window_bounds = array<i64: 9, 8, 8>}, {pipeline_mode = #tpu.pipeline_mode<synchronous>, transform_indices = @transform_6, window_bounds = array<i64: 1, 8>}, {transform_indices = @transform_7, window_bounds = array<i64: 1, 64, 8>}]} {
    %cst = arith.constant 0.000000e+00 : f32
    %0 = vector.broadcast %cst : f32 to vector<10x10x4xf32>
    %c0 = arith.constant 0 : index
    %c0_0 = arith.constant 0 : index
    %c0_1 = arith.constant 0 : index
    %1 = vector.load %arg9[%c0, %c0_0, %c0_1] : memref<10x10x4xf32, #tpu.memory_space<vmem>>, vector<10x10x4xf32>
    tpu.vector_store %arg9[%c0, %c0_0, %c0_1], %0 {strides = array<i32>} : memref<10x10x4xf32, #tpu.memory_space<vmem>>, vector<10x10x4xf32>,
    %cst_2 = arith.constant 0.000000e+00 : f32
    %2 = vector.broadcast %cst_2 : f32 to vector<10x10x8xf32>
    %c0_3 = arith.constant 0 : index
    %c0_4 = arith.constant 0 : index
    %c0_5 = arith.constant 0 : index
    %3 = vector.load %arg10[%c0_3, %c0_4, %c0_5] : memref<10x10x8xf32, #tpu.memory_space<vmem>>, vector<10x10x8xf32>
    tpu.vector_store %arg10[%c0_3, %c0_4, %c0_5], %2 {strides = array<i32>} : memref<10x10x8xf32, #tpu.memory_space<vmem>>, vector<10x10x8xf32>,
    %c0_6 = arith.constant 0 : index
    %c0_7 = arith.constant 0 : index
    %c0_8 = arith.constant 0 : index
    %c0_9 = arith.constant 0 : index
    %4 = vector.load %arg1[%c0_6, %c0_7, %c0_8, %c0_9] : memref<1x16x8x8xf32, #tpu.memory_space<vmem>>, vector<1x16x8x8xf32>
    %5 = vector.shape_cast %4 : vector<1x16x8x8xf32> to vector<16x8x8xf32>
    %6 = vector.extract_strided_slice %5 {offsets = [0, 0, 0], sizes = [16, 8, 4], strides = [1, 1, 1]} : vector<16x8x8xf32> to vector<16x8x4xf32>
    %7 = vector.extract_strided_slice %5 {offsets = [0, 0, 4], sizes = [16, 8, 4], strides = [1, 1, 1]} : vector<16x8x8xf32> to vector<16x8x4xf32>
    %8 = arith.maximumf %6, %7 : vector<16x8x4xf32>
    %9 = vector.shape_cast %8 : vector<16x8x4xf32> to vector<8x2x8x4xf32>
    %10 = vector.extract_strided_slice %9 {offsets = [0, 0, 0, 0], sizes = [8, 1, 8, 4], strides = [1, 1, 1, 1]} : vector<8x2x8x4xf32> to vector<8x1x8x4xf32>
    %11 = vector.shape_cast %10 : vector<8x1x8x4xf32> to vector<8x8x4xf32>
    %12 = vector.extract_strided_slice %9 {offsets = [0, 1, 0, 0], sizes = [8, 1, 8, 4], strides = [1, 1, 1, 1]} : vector<8x2x8x4xf32> to vector<8x1x8x4xf32>
    %13 = vector.shape_cast %12 : vector<8x1x8x4xf32> to vector<8x8x4xf32>
    %14 = arith.maximumf %11, %13 : vector<8x8x4xf32>
    %c1 = arith.constant 1 : index
    %c1_10 = arith.constant 1 : index
    %c0_11 = arith.constant 0 : index
    %15 = vector.load %arg9[%c1, %c1_10, %c0_11] : memref<10x10x4xf32, #tpu.memory_space<vmem>>, vector<8x8x4xf32>
    tpu.vector_store %arg9[%c1, %c1_10, %c0_11], %14 {strides = array<i32>} : memref<10x10x4xf32, #tpu.memory_space<vmem>>, vector<8x8x4xf32>,
    %cst_12 = arith.constant 0.000000e+00 : f32
    %16 = vector.broadcast %cst_12 : f32 to vector<64x8xf32>
    %c0_13 = arith.constant 0 : index
    %c0_14 = arith.constant 0 : index
    %c0_15 = arith.constant 0 : index
    %17 = vector.load %arg9[%c0_13, %c0_14, %c0_15] : memref<10x10x4xf32, #tpu.memory_space<vmem>>, vector<8x8x4xf32>
    %18 = vector.shape_cast %17 : vector<8x8x4xf32> to vector<64x4xf32>
    %19 = arith.truncf %18 : vector<64x4xf32> to vector<64x4xbf16>
    %c0_16 = arith.constant 0 : index
    %c0_17 = arith.constant 0 : index
    %c0_18 = arith.constant 0 : index
    %20 = vector.load %arg2[%c0_16, %c0_17, %c0_18] : memref<9x4x8xbf16, #tpu.memory_space<vmem>>, vector<1x4x8xbf16>
    %21 = vector.shape_cast %20 : vector<1x4x8xbf16> to vector<4x8xbf16>
    %cst_19 = arith.constant dense<0.000000e+00> : vector<64x8xf32>
    %22 = tpu.matmul %19, %21, %cst_19 {dimension_numbers = #tpu.dot_dimension_numbers<[1], [0], [0], [1], [0, 0, 1, 1], [], []>} : vector<64x4xbf16>, vector<4x8xbf16>, vector<64x8xf32> -> vector<64x8xf32>
    %23 = arith.addf %16, %22 : vector<64x8xf32>
    %c0_20 = arith.constant 0 : index
    %c1_21 = arith.constant 1 : index
    %c0_22 = arith.constant 0 : index
    %24 = vector.load %arg9[%c0_20, %c1_21, %c0_22] : memref<10x10x4xf32, #tpu.memory_space<vmem>>, vector<8x8x4xf32>
    %25 = vector.shape_cast %24 : vector<8x8x4xf32> to vector<64x4xf32>
    %26 = arith.truncf %25 : vector<64x4xf32> to vector<64x4xbf16>
    %c1_23 = arith.constant 1 : index
    %c0_24 = arith.constant 0 : index
    %c0_25 = arith.constant 0 : index
    %27 = vector.load %arg2[%c1_23, %c0_24, %c0_25] : memref<9x4x8xbf16, #tpu.memory_space<vmem>>, vector<1x4x8xbf16>
    %28 = vector.shape_cast %27 : vector<1x4x8xbf16> to vector<4x8xbf16>
    %cst_26 = arith.constant dense<0.000000e+00> : vector<64x8xf32>
    %29 = tpu.matmul %26, %28, %cst_26 {dimension_numbers = #tpu.dot_dimension_numbers<[1], [0], [0], [1], [0, 0, 1, 1], [], []>} : vector<64x4xbf16>, vector<4x8xbf16>, vector<64x8xf32> -> vector<64x8xf32>
    %30 = arith.addf %23, %29 : vector<64x8xf32>
    %c0_27 = arith.constant 0 : index
    %c2 = arith.constant 2 : index
    %c0_28 = arith.constant 0 : index
    %31 = vector.load %arg9[%c0_27, %c2, %c0_28] : memref<10x10x4xf32, #tpu.memory_space<vmem>>, vector<8x8x4xf32>
    %32 = vector.shape_cast %31 : vector<8x8x4xf32> to vector<64x4xf32>
    %33 = arith.truncf %32 : vector<64x4xf32> to vector<64x4xbf16>
    %c2_29 = arith.constant 2 : index
    %c0_30 = arith.constant 0 : index
    %c0_31 = arith.constant 0 : index
    %34 = vector.load %arg2[%c2_29, %c0_30, %c0_31] : memref<9x4x8xbf16, #tpu.memory_space<vmem>>, vector<1x4x8xbf16>
    %35 = vector.shape_cast %34 : vector<1x4x8xbf16> to vector<4x8xbf16>
    %cst_32 = arith.constant dense<0.000000e+00> : vector<64x8xf32>
    %36 = tpu.matmul %33, %35, %cst_32 {dimension_numbers = #tpu.dot_dimension_numbers<[1], [0], [0], [1], [0, 0, 1, 1], [], []>} : vector<64x4xbf16>, vector<4x8xbf16>, vector<64x8xf32> -> vector<64x8xf32>
    %37 = arith.addf %30, %36 : vector<64x8xf32>
    %c1_33 = arith.constant 1 : index
    %c0_34 = arith.constant 0 : index
    %c0_35 = arith.constant 0 : index
    %38 = vector.load %arg9[%c1_33, %c0_34, %c0_35] : memref<10x10x4xf32, #tpu.memory_space<vmem>>, vector<8x8x4xf32>
    %39 = vector.shape_cast %38 : vector<8x8x4xf32> to vector<64x4xf32>
    %40 = arith.truncf %39 : vector<64x4xf32> to vector<64x4xbf16>
    %c3 = arith.constant 3 : index
    %c0_36 = arith.constant 0 : index
    %c0_37 = arith.constant 0 : index
    %41 = vector.load %arg2[%c3, %c0_36, %c0_37] : memref<9x4x8xbf16, #tpu.memory_space<vmem>>, vector<1x4x8xbf16>
    %42 = vector.shape_cast %41 : vector<1x4x8xbf16> to vector<4x8xbf16>
    %cst_38 = arith.constant dense<0.000000e+00> : vector<64x8xf32>
    %43 = tpu.matmul %40, %42, %cst_38 {dimension_numbers = #tpu.dot_dimension_numbers<[1], [0], [0], [1], [0, 0, 1, 1], [], []>} : vector<64x4xbf16>, vector<4x8xbf16>, vector<64x8xf32> -> vector<64x8xf32>
    %44 = arith.addf %37, %43 : vector<64x8xf32>
    %c1_39 = arith.constant 1 : index
    %c1_40 = arith.constant 1 : index
    %c0_41 = arith.constant 0 : index
    %45 = vector.load %arg9[%c1_39, %c1_40, %c0_41] : memref<10x10x4xf32, #tpu.memory_space<vmem>>, vector<8x8x4xf32>
    %46 = vector.shape_cast %45 : vector<8x8x4xf32> to vector<64x4xf32>
    %47 = arith.truncf %46 : vector<64x4xf32> to vector<64x4xbf16>
    %c4 = arith.constant 4 : index
    %c0_42 = arith.constant 0 : index
    %c0_43 = arith.constant 0 : index
    %48 = vector.load %arg2[%c4, %c0_42, %c0_43] : memref<9x4x8xbf16, #tpu.memory_space<vmem>>, vector<1x4x8xbf16>
    %49 = vector.shape_cast %48 : vector<1x4x8xbf16> to vector<4x8xbf16>
    %cst_44 = arith.constant dense<0.000000e+00> : vector<64x8xf32>
    %50 = tpu.matmul %47, %49, %cst_44 {dimension_numbers = #tpu.dot_dimension_numbers<[1], [0], [0], [1], [0, 0, 1, 1], [], []>} : vector<64x4xbf16>, vector<4x8xbf16>, vector<64x8xf32> -> vector<64x8xf32>
    %51 = arith.addf %44, %50 : vector<64x8xf32>
    %c1_45 = arith.constant 1 : index
    %c2_46 = arith.constant 2 : index
    %c0_47 = arith.constant 0 : index
    %52 = vector.load %arg9[%c1_45, %c2_46, %c0_47] : memref<10x10x4xf32, #tpu.memory_space<vmem>>, vector<8x8x4xf32>
    %53 = vector.shape_cast %52 : vector<8x8x4xf32> to vector<64x4xf32>
    %54 = arith.truncf %53 : vector<64x4xf32> to vector<64x4xbf16>
    %c5 = arith.constant 5 : index
    %c0_48 = arith.constant 0 : index
    %c0_49 = arith.constant 0 : index
    %55 = vector.load %arg2[%c5, %c0_48, %c0_49] : memref<9x4x8xbf16, #tpu.memory_space<vmem>>, vector<1x4x8xbf16>
    %56 = vector.shape_cast %55 : vector<1x4x8xbf16> to vector<4x8xbf16>
    %cst_50 = arith.constant dense<0.000000e+00> : vector<64x8xf32>
    %57 = tpu.matmul %54, %56, %cst_50 {dimension_numbers = #tpu.dot_dimension_numbers<[1], [0], [0], [1], [0, 0, 1, 1], [], []>} : vector<64x4xbf16>, vector<4x8xbf16>, vector<64x8xf32> -> vector<64x8xf32>
    %58 = arith.addf %51, %57 : vector<64x8xf32>
    %c2_51 = arith.constant 2 : index
    %c0_52 = arith.constant 0 : index
    %c0_53 = arith.constant 0 : index
    %59 = vector.load %arg9[%c2_51, %c0_52, %c0_53] : memref<10x10x4xf32, #tpu.memory_space<vmem>>, vector<8x8x4xf32>
    %60 = vector.shape_cast %59 : vector<8x8x4xf32> to vector<64x4xf32>
    %61 = arith.truncf %60 : vector<64x4xf32> to vector<64x4xbf16>
    %c6 = arith.constant 6 : index
    %c0_54 = arith.constant 0 : index
    %c0_55 = arith.constant 0 : index
    %62 = vector.load %arg2[%c6, %c0_54, %c0_55] : memref<9x4x8xbf16, #tpu.memory_space<vmem>>, vector<1x4x8xbf16>
    %63 = vector.shape_cast %62 : vector<1x4x8xbf16> to vector<4x8xbf16>
    %cst_56 = arith.constant dense<0.000000e+00> : vector<64x8xf32>
    %64 = tpu.matmul %61, %63, %cst_56 {dimension_numbers = #tpu.dot_dimension_numbers<[1], [0], [0], [1], [0, 0, 1, 1], [], []>} : vector<64x4xbf16>, vector<4x8xbf16>, vector<64x8xf32> -> vector<64x8xf32>
    %65 = arith.addf %58, %64 : vector<64x8xf32>
    %c2_57 = arith.constant 2 : index
    %c1_58 = arith.constant 1 : index
    %c0_59 = arith.constant 0 : index
    %66 = vector.load %arg9[%c2_57, %c1_58, %c0_59] : memref<10x10x4xf32, #tpu.memory_space<vmem>>, vector<8x8x4xf32>
    %67 = vector.shape_cast %66 : vector<8x8x4xf32> to vector<64x4xf32>
    %68 = arith.truncf %67 : vector<64x4xf32> to vector<64x4xbf16>
    %c7 = arith.constant 7 : index
    %c0_60 = arith.constant 0 : index
    %c0_61 = arith.constant 0 : index
    %69 = vector.load %arg2[%c7, %c0_60, %c0_61] : memref<9x4x8xbf16, #tpu.memory_space<vmem>>, vector<1x4x8xbf16>
    %70 = vector.shape_cast %69 : vector<1x4x8xbf16> to vector<4x8xbf16>
    %cst_62 = arith.constant dense<0.000000e+00> : vector<64x8xf32>
    %71 = tpu.matmul %68, %70, %cst_62 {dimension_numbers = #tpu.dot_dimension_numbers<[1], [0], [0], [1], [0, 0, 1, 1], [], []>} : vector<64x4xbf16>, vector<4x8xbf16>, vector<64x8xf32> -> vector<64x8xf32>
    %72 = arith.addf %65, %71 : vector<64x8xf32>
    %c2_63 = arith.constant 2 : index
    %c2_64 = arith.constant 2 : index
    %c0_65 = arith.constant 0 : index
    %73 = vector.load %arg9[%c2_63, %c2_64, %c0_65] : memref<10x10x4xf32, #tpu.memory_space<vmem>>, vector<8x8x4xf32>
    %74 = vector.shape_cast %73 : vector<8x8x4xf32> to vector<64x4xf32>
    %75 = arith.truncf %74 : vector<64x4xf32> to vector<64x4xbf16>
    %c8 = arith.constant 8 : index
    %c0_66 = arith.constant 0 : index
    %c0_67 = arith.constant 0 : index
    %76 = vector.load %arg2[%c8, %c0_66, %c0_67] : memref<9x4x8xbf16, #tpu.memory_space<vmem>>, vector<1x4x8xbf16>
    %77 = vector.shape_cast %76 : vector<1x4x8xbf16> to vector<4x8xbf16>
    %cst_68 = arith.constant dense<0.000000e+00> : vector<64x8xf32>
    %78 = tpu.matmul %75, %77, %cst_68 {dimension_numbers = #tpu.dot_dimension_numbers<[1], [0], [0], [1], [0, 0, 1, 1], [], []>} : vector<64x4xbf16>, vector<4x8xbf16>, vector<64x8xf32> -> vector<64x8xf32>
    %79 = arith.addf %72, %78 : vector<64x8xf32>
    %c0_69 = arith.constant 0 : index
    %c0_70 = arith.constant 0 : index
    %80 = vector.load %arg3[%c0_69, %c0_70] : memref<1x8xf32, #tpu.memory_space<vmem>>, vector<1x8xf32>
    %81 = vector.broadcast %80 : vector<1x8xf32> to vector<64x8xf32>
    %82 = arith.addf %79, %81 : vector<64x8xf32>
    %cst_71 = arith.constant 0.000000e+00 : f32
    %83 = vector.broadcast %cst_71 : f32 to vector<64x8xf32>
    %84 = arith.maximumf %82, %83 : vector<64x8xf32>
    %85 = vector.shape_cast %84 : vector<64x8xf32> to vector<8x8x8xf32>
    %c1_72 = arith.constant 1 : index
    %c1_73 = arith.constant 1 : index
    %c0_74 = arith.constant 0 : index
    %86 = vector.load %arg10[%c1_72, %c1_73, %c0_74] : memref<10x10x8xf32, #tpu.memory_space<vmem>>, vector<8x8x8xf32>
    tpu.vector_store %arg10[%c1_72, %c1_73, %c0_74], %85 {strides = array<i32>} : memref<10x10x8xf32, #tpu.memory_space<vmem>>, vector<8x8x8xf32>,
    %cst_75 = arith.constant 0.000000e+00 : f32
    %87 = vector.broadcast %cst_75 : f32 to vector<64x8xf32>
    %c0_76 = arith.constant 0 : index
    %c0_77 = arith.constant 0 : index
    %c0_78 = arith.constant 0 : index
    %88 = vector.load %arg10[%c0_76, %c0_77, %c0_78] : memref<10x10x8xf32, #tpu.memory_space<vmem>>, vector<8x8x8xf32>
    %89 = vector.shape_cast %88 : vector<8x8x8xf32> to vector<64x8xf32>
    %90 = arith.truncf %89 : vector<64x8xf32> to vector<64x8xbf16>
    %c0_79 = arith.constant 0 : index
    %c0_80 = arith.constant 0 : index
    %c0_81 = arith.constant 0 : index
    %91 = vector.load %arg4[%c0_79, %c0_80, %c0_81] : memref<9x8x8xbf16, #tpu.memory_space<vmem>>, vector<1x8x8xbf16>
    %92 = vector.shape_cast %91 : vector<1x8x8xbf16> to vector<8x8xbf16>
    %cst_82 = arith.constant dense<0.000000e+00> : vector<64x8xf32>
    %93 = tpu.matmul %90, %92, %cst_82 {dimension_numbers = #tpu.dot_dimension_numbers<[1], [0], [0], [1], [0, 0, 1, 1], [], []>} : vector<64x8xbf16>, vector<8x8xbf16>, vector<64x8xf32> -> vector<64x8xf32>
    %94 = arith.addf %87, %93 : vector<64x8xf32>
    %c0_83 = arith.constant 0 : index
    %c1_84 = arith.constant 1 : index
    %c0_85 = arith.constant 0 : index
    %95 = vector.load %arg10[%c0_83, %c1_84, %c0_85] : memref<10x10x8xf32, #tpu.memory_space<vmem>>, vector<8x8x8xf32>
    %96 = vector.shape_cast %95 : vector<8x8x8xf32> to vector<64x8xf32>
    %97 = arith.truncf %96 : vector<64x8xf32> to vector<64x8xbf16>
    %c1_86 = arith.constant 1 : index
    %c0_87 = arith.constant 0 : index
    %c0_88 = arith.constant 0 : index
    %98 = vector.load %arg4[%c1_86, %c0_87, %c0_88] : memref<9x8x8xbf16, #tpu.memory_space<vmem>>, vector<1x8x8xbf16>
    %99 = vector.shape_cast %98 : vector<1x8x8xbf16> to vector<8x8xbf16>
    %cst_89 = arith.constant dense<0.000000e+00> : vector<64x8xf32>
    %100 = tpu.matmul %97, %99, %cst_89 {dimension_numbers = #tpu.dot_dimension_numbers<[1], [0], [0], [1], [0, 0, 1, 1], [], []>} : vector<64x8xbf16>, vector<8x8xbf16>, vector<64x8xf32> -> vector<64x8xf32>
    %101 = arith.addf %94, %100 : vector<64x8xf32>
    %c0_90 = arith.constant 0 : index
    %c2_91 = arith.constant 2 : index
    %c0_92 = arith.constant 0 : index
    %102 = vector.load %arg10[%c0_90, %c2_91, %c0_92] : memref<10x10x8xf32, #tpu.memory_space<vmem>>, vector<8x8x8xf32>
    %103 = vector.shape_cast %102 : vector<8x8x8xf32> to vector<64x8xf32>
    %104 = arith.truncf %103 : vector<64x8xf32> to vector<64x8xbf16>
    %c2_93 = arith.constant 2 : index
    %c0_94 = arith.constant 0 : index
    %c0_95 = arith.constant 0 : index
    %105 = vector.load %arg4[%c2_93, %c0_94, %c0_95] : memref<9x8x8xbf16, #tpu.memory_space<vmem>>, vector<1x8x8xbf16>
    %106 = vector.shape_cast %105 : vector<1x8x8xbf16> to vector<8x8xbf16>
    %cst_96 = arith.constant dense<0.000000e+00> : vector<64x8xf32>
    %107 = tpu.matmul %104, %106, %cst_96 {dimension_numbers = #tpu.dot_dimension_numbers<[1], [0], [0], [1], [0, 0, 1, 1], [], []>} : vector<64x8xbf16>, vector<8x8xbf16>, vector<64x8xf32> -> vector<64x8xf32>
    %108 = arith.addf %101, %107 : vector<64x8xf32>
    %c1_97 = arith.constant 1 : index
    %c0_98 = arith.constant 0 : index
    %c0_99 = arith.constant 0 : index
    %109 = vector.load %arg10[%c1_97, %c0_98, %c0_99] : memref<10x10x8xf32, #tpu.memory_space<vmem>>, vector<8x8x8xf32>
    %110 = vector.shape_cast %109 : vector<8x8x8xf32> to vector<64x8xf32>
    %111 = arith.truncf %110 : vector<64x8xf32> to vector<64x8xbf16>
    %c3_100 = arith.constant 3 : index
    %c0_101 = arith.constant 0 : index
    %c0_102 = arith.constant 0 : index
    %112 = vector.load %arg4[%c3_100, %c0_101, %c0_102] : memref<9x8x8xbf16, #tpu.memory_space<vmem>>, vector<1x8x8xbf16>
    %113 = vector.shape_cast %112 : vector<1x8x8xbf16> to vector<8x8xbf16>
    %cst_103 = arith.constant dense<0.000000e+00> : vector<64x8xf32>
    %114 = tpu.matmul %111, %113, %cst_103 {dimension_numbers = #tpu.dot_dimension_numbers<[1], [0], [0], [1], [0, 0, 1, 1], [], []>} : vector<64x8xbf16>, vector<8x8xbf16>, vector<64x8xf32> -> vector<64x8xf32>
    %115 = arith.addf %108, %114 : vector<64x8xf32>
    %c1_104 = arith.constant 1 : index
    %c1_105 = arith.constant 1 : index
    %c0_106 = arith.constant 0 : index
    %116 = vector.load %arg10[%c1_104, %c1_105, %c0_106] : memref<10x10x8xf32, #tpu.memory_space<vmem>>, vector<8x8x8xf32>
    %117 = vector.shape_cast %116 : vector<8x8x8xf32> to vector<64x8xf32>
    %118 = arith.truncf %117 : vector<64x8xf32> to vector<64x8xbf16>
    %c4_107 = arith.constant 4 : index
    %c0_108 = arith.constant 0 : index
    %c0_109 = arith.constant 0 : index
    %119 = vector.load %arg4[%c4_107, %c0_108, %c0_109] : memref<9x8x8xbf16, #tpu.memory_space<vmem>>, vector<1x8x8xbf16>
    %120 = vector.shape_cast %119 : vector<1x8x8xbf16> to vector<8x8xbf16>
    %cst_110 = arith.constant dense<0.000000e+00> : vector<64x8xf32>
    %121 = tpu.matmul %118, %120, %cst_110 {dimension_numbers = #tpu.dot_dimension_numbers<[1], [0], [0], [1], [0, 0, 1, 1], [], []>} : vector<64x8xbf16>, vector<8x8xbf16>, vector<64x8xf32> -> vector<64x8xf32>
    %122 = arith.addf %115, %121 : vector<64x8xf32>
    %c1_111 = arith.constant 1 : index
    %c2_112 = arith.constant 2 : index
    %c0_113 = arith.constant 0 : index
    %123 = vector.load %arg10[%c1_111, %c2_112, %c0_113] : memref<10x10x8xf32, #tpu.memory_space<vmem>>, vector<8x8x8xf32>
    %124 = vector.shape_cast %123 : vector<8x8x8xf32> to vector<64x8xf32>
    %125 = arith.truncf %124 : vector<64x8xf32> to vector<64x8xbf16>
    %c5_114 = arith.constant 5 : index
    %c0_115 = arith.constant 0 : index
    %c0_116 = arith.constant 0 : index
    %126 = vector.load %arg4[%c5_114, %c0_115, %c0_116] : memref<9x8x8xbf16, #tpu.memory_space<vmem>>, vector<1x8x8xbf16>
    %127 = vector.shape_cast %126 : vector<1x8x8xbf16> to vector<8x8xbf16>
    %cst_117 = arith.constant dense<0.000000e+00> : vector<64x8xf32>
    %128 = tpu.matmul %125, %127, %cst_117 {dimension_numbers = #tpu.dot_dimension_numbers<[1], [0], [0], [1], [0, 0, 1, 1], [], []>} : vector<64x8xbf16>, vector<8x8xbf16>, vector<64x8xf32> -> vector<64x8xf32>
    %129 = arith.addf %122, %128 : vector<64x8xf32>
    %c2_118 = arith.constant 2 : index
    %c0_119 = arith.constant 0 : index
    %c0_120 = arith.constant 0 : index
    %130 = vector.load %arg10[%c2_118, %c0_119, %c0_120] : memref<10x10x8xf32, #tpu.memory_space<vmem>>, vector<8x8x8xf32>
    %131 = vector.shape_cast %130 : vector<8x8x8xf32> to vector<64x8xf32>
    %132 = arith.truncf %131 : vector<64x8xf32> to vector<64x8xbf16>
    %c6_121 = arith.constant 6 : index
    %c0_122 = arith.constant 0 : index
    %c0_123 = arith.constant 0 : index
    %133 = vector.load %arg4[%c6_121, %c0_122, %c0_123] : memref<9x8x8xbf16, #tpu.memory_space<vmem>>, vector<1x8x8xbf16>
    %134 = vector.shape_cast %133 : vector<1x8x8xbf16> to vector<8x8xbf16>
    %cst_124 = arith.constant dense<0.000000e+00> : vector<64x8xf32>
    %135 = tpu.matmul %132, %134, %cst_124 {dimension_numbers = #tpu.dot_dimension_numbers<[1], [0], [0], [1], [0, 0, 1, 1], [], []>} : vector<64x8xbf16>, vector<8x8xbf16>, vector<64x8xf32> -> vector<64x8xf32>
    %136 = arith.addf %129, %135 : vector<64x8xf32>
    %c2_125 = arith.constant 2 : index
    %c1_126 = arith.constant 1 : index
    %c0_127 = arith.constant 0 : index
    %137 = vector.load %arg10[%c2_125, %c1_126, %c0_127] : memref<10x10x8xf32, #tpu.memory_space<vmem>>, vector<8x8x8xf32>
    %138 = vector.shape_cast %137 : vector<8x8x8xf32> to vector<64x8xf32>
    %139 = arith.truncf %138 : vector<64x8xf32> to vector<64x8xbf16>
    %c7_128 = arith.constant 7 : index
    %c0_129 = arith.constant 0 : index
    %c0_130 = arith.constant 0 : index
    %140 = vector.load %arg4[%c7_128, %c0_129, %c0_130] : memref<9x8x8xbf16, #tpu.memory_space<vmem>>, vector<1x8x8xbf16>
    %141 = vector.shape_cast %140 : vector<1x8x8xbf16> to vector<8x8xbf16>
    %cst_131 = arith.constant dense<0.000000e+00> : vector<64x8xf32>
    %142 = tpu.matmul %139, %141, %cst_131 {dimension_numbers = #tpu.dot_dimension_numbers<[1], [0], [0], [1], [0, 0, 1, 1], [], []>} : vector<64x8xbf16>, vector<8x8xbf16>, vector<64x8xf32> -> vector<64x8xf32>
    %143 = arith.addf %136, %142 : vector<64x8xf32>
    %c2_132 = arith.constant 2 : index
    %c2_133 = arith.constant 2 : index
    %c0_134 = arith.constant 0 : index
    %144 = vector.load %arg10[%c2_132, %c2_133, %c0_134] : memref<10x10x8xf32, #tpu.memory_space<vmem>>, vector<8x8x8xf32>
    %145 = vector.shape_cast %144 : vector<8x8x8xf32> to vector<64x8xf32>
    %146 = arith.truncf %145 : vector<64x8xf32> to vector<64x8xbf16>
    %c8_135 = arith.constant 8 : index
    %c0_136 = arith.constant 0 : index
    %c0_137 = arith.constant 0 : index
    %147 = vector.load %arg4[%c8_135, %c0_136, %c0_137] : memref<9x8x8xbf16, #tpu.memory_space<vmem>>, vector<1x8x8xbf16>
    %148 = vector.shape_cast %147 : vector<1x8x8xbf16> to vector<8x8xbf16>
    %cst_138 = arith.constant dense<0.000000e+00> : vector<64x8xf32>
    %149 = tpu.matmul %146, %148, %cst_138 {dimension_numbers = #tpu.dot_dimension_numbers<[1], [0], [0], [1], [0, 0, 1, 1], [], []>} : vector<64x8xbf16>, vector<8x8xbf16>, vector<64x8xf32> -> vector<64x8xf32>
    %150 = arith.addf %143, %149 : vector<64x8xf32>
    %c0_139 = arith.constant 0 : index
    %c0_140 = arith.constant 0 : index
    %151 = vector.load %arg5[%c0_139, %c0_140] : memref<1x8xf32, #tpu.memory_space<vmem>>, vector<1x8xf32>
    %152 = vector.broadcast %151 : vector<1x8xf32> to vector<64x8xf32>
    %153 = arith.addf %150, %152 : vector<64x8xf32>
    %cst_141 = arith.constant 0.000000e+00 : f32
    %154 = vector.broadcast %cst_141 : f32 to vector<64x8xf32>
    %155 = arith.maximumf %153, %154 : vector<64x8xf32>
    %156 = vector.shape_cast %155 : vector<64x8xf32> to vector<8x8x8xf32>
    %c1_142 = arith.constant 1 : index
    %c1_143 = arith.constant 1 : index
    %c0_144 = arith.constant 0 : index
    %157 = vector.load %arg10[%c1_142, %c1_143, %c0_144] : memref<10x10x8xf32, #tpu.memory_space<vmem>>, vector<8x8x8xf32>
    tpu.vector_store %arg10[%c1_142, %c1_143, %c0_144], %156 {strides = array<i32>} : memref<10x10x8xf32, #tpu.memory_space<vmem>>, vector<8x8x8xf32>,
    %cst_145 = arith.constant 0.000000e+00 : f32
    %158 = vector.broadcast %cst_145 : f32 to vector<64x8xf32>
    %c0_146 = arith.constant 0 : index
    %c0_147 = arith.constant 0 : index
    %c0_148 = arith.constant 0 : index
    %159 = vector.load %arg10[%c0_146, %c0_147, %c0_148] : memref<10x10x8xf32, #tpu.memory_space<vmem>>, vector<8x8x8xf32>
    %160 = vector.shape_cast %159 : vector<8x8x8xf32> to vector<64x8xf32>
    %161 = arith.truncf %160 : vector<64x8xf32> to vector<64x8xbf16>
    %c0_149 = arith.constant 0 : index
    %c0_150 = arith.constant 0 : index
    %c0_151 = arith.constant 0 : index
    %162 = vector.load %arg6[%c0_149, %c0_150, %c0_151] : memref<9x8x8xbf16, #tpu.memory_space<vmem>>, vector<1x8x8xbf16>
    %163 = vector.shape_cast %162 : vector<1x8x8xbf16> to vector<8x8xbf16>
    %cst_152 = arith.constant dense<0.000000e+00> : vector<64x8xf32>
    %164 = tpu.matmul %161, %163, %cst_152 {dimension_numbers = #tpu.dot_dimension_numbers<[1], [0], [0], [1], [0, 0, 1, 1], [], []>} : vector<64x8xbf16>, vector<8x8xbf16>, vector<64x8xf32> -> vector<64x8xf32>
    %165 = arith.addf %158, %164 : vector<64x8xf32>
    %c0_153 = arith.constant 0 : index
    %c1_154 = arith.constant 1 : index
    %c0_155 = arith.constant 0 : index
    %166 = vector.load %arg10[%c0_153, %c1_154, %c0_155] : memref<10x10x8xf32, #tpu.memory_space<vmem>>, vector<8x8x8xf32>
    %167 = vector.shape_cast %166 : vector<8x8x8xf32> to vector<64x8xf32>
    %168 = arith.truncf %167 : vector<64x8xf32> to vector<64x8xbf16>
    %c1_156 = arith.constant 1 : index
    %c0_157 = arith.constant 0 : index
    %c0_158 = arith.constant 0 : index
    %169 = vector.load %arg6[%c1_156, %c0_157, %c0_158] : memref<9x8x8xbf16, #tpu.memory_space<vmem>>, vector<1x8x8xbf16>
    %170 = vector.shape_cast %169 : vector<1x8x8xbf16> to vector<8x8xbf16>
    %cst_159 = arith.constant dense<0.000000e+00> : vector<64x8xf32>
    %171 = tpu.matmul %168, %170, %cst_159 {dimension_numbers = #tpu.dot_dimension_numbers<[1], [0], [0], [1], [0, 0, 1, 1], [], []>} : vector<64x8xbf16>, vector<8x8xbf16>, vector<64x8xf32> -> vector<64x8xf32>
    %172 = arith.addf %165, %171 : vector<64x8xf32>
    %c0_160 = arith.constant 0 : index
    %c2_161 = arith.constant 2 : index
    %c0_162 = arith.constant 0 : index
    %173 = vector.load %arg10[%c0_160, %c2_161, %c0_162] : memref<10x10x8xf32, #tpu.memory_space<vmem>>, vector<8x8x8xf32>
    %174 = vector.shape_cast %173 : vector<8x8x8xf32> to vector<64x8xf32>
    %175 = arith.truncf %174 : vector<64x8xf32> to vector<64x8xbf16>
    %c2_163 = arith.constant 2 : index
    %c0_164 = arith.constant 0 : index
    %c0_165 = arith.constant 0 : index
    %176 = vector.load %arg6[%c2_163, %c0_164, %c0_165] : memref<9x8x8xbf16, #tpu.memory_space<vmem>>, vector<1x8x8xbf16>
    %177 = vector.shape_cast %176 : vector<1x8x8xbf16> to vector<8x8xbf16>
    %cst_166 = arith.constant dense<0.000000e+00> : vector<64x8xf32>
    %178 = tpu.matmul %175, %177, %cst_166 {dimension_numbers = #tpu.dot_dimension_numbers<[1], [0], [0], [1], [0, 0, 1, 1], [], []>} : vector<64x8xbf16>, vector<8x8xbf16>, vector<64x8xf32> -> vector<64x8xf32>
    %179 = arith.addf %172, %178 : vector<64x8xf32>
    %c1_167 = arith.constant 1 : index
    %c0_168 = arith.constant 0 : index
    %c0_169 = arith.constant 0 : index
    %180 = vector.load %arg10[%c1_167, %c0_168, %c0_169] : memref<10x10x8xf32, #tpu.memory_space<vmem>>, vector<8x8x8xf32>
    %181 = vector.shape_cast %180 : vector<8x8x8xf32> to vector<64x8xf32>
    %182 = arith.truncf %181 : vector<64x8xf32> to vector<64x8xbf16>
    %c3_170 = arith.constant 3 : index
    %c0_171 = arith.constant 0 : index
    %c0_172 = arith.constant 0 : index
    %183 = vector.load %arg6[%c3_170, %c0_171, %c0_172] : memref<9x8x8xbf16, #tpu.memory_space<vmem>>, vector<1x8x8xbf16>
    %184 = vector.shape_cast %183 : vector<1x8x8xbf16> to vector<8x8xbf16>
    %cst_173 = arith.constant dense<0.000000e+00> : vector<64x8xf32>
    %185 = tpu.matmul %182, %184, %cst_173 {dimension_numbers = #tpu.dot_dimension_numbers<[1], [0], [0], [1], [0, 0, 1, 1], [], []>} : vector<64x8xbf16>, vector<8x8xbf16>, vector<64x8xf32> -> vector<64x8xf32>
    %186 = arith.addf %179, %185 : vector<64x8xf32>
    %c1_174 = arith.constant 1 : index
    %c1_175 = arith.constant 1 : index
    %c0_176 = arith.constant 0 : index
    %187 = vector.load %arg10[%c1_174, %c1_175, %c0_176] : memref<10x10x8xf32, #tpu.memory_space<vmem>>, vector<8x8x8xf32>
    %188 = vector.shape_cast %187 : vector<8x8x8xf32> to vector<64x8xf32>
    %189 = arith.truncf %188 : vector<64x8xf32> to vector<64x8xbf16>
    %c4_177 = arith.constant 4 : index
    %c0_178 = arith.constant 0 : index
    %c0_179 = arith.constant 0 : index
    %190 = vector.load %arg6[%c4_177, %c0_178, %c0_179] : memref<9x8x8xbf16, #tpu.memory_space<vmem>>, vector<1x8x8xbf16>
    %191 = vector.shape_cast %190 : vector<1x8x8xbf16> to vector<8x8xbf16>
    %cst_180 = arith.constant dense<0.000000e+00> : vector<64x8xf32>
    %192 = tpu.matmul %189, %191, %cst_180 {dimension_numbers = #tpu.dot_dimension_numbers<[1], [0], [0], [1], [0, 0, 1, 1], [], []>} : vector<64x8xbf16>, vector<8x8xbf16>, vector<64x8xf32> -> vector<64x8xf32>
    %193 = arith.addf %186, %192 : vector<64x8xf32>
    %c1_181 = arith.constant 1 : index
    %c2_182 = arith.constant 2 : index
    %c0_183 = arith.constant 0 : index
    %194 = vector.load %arg10[%c1_181, %c2_182, %c0_183] : memref<10x10x8xf32, #tpu.memory_space<vmem>>, vector<8x8x8xf32>
    %195 = vector.shape_cast %194 : vector<8x8x8xf32> to vector<64x8xf32>
    %196 = arith.truncf %195 : vector<64x8xf32> to vector<64x8xbf16>
    %c5_184 = arith.constant 5 : index
    %c0_185 = arith.constant 0 : index
    %c0_186 = arith.constant 0 : index
    %197 = vector.load %arg6[%c5_184, %c0_185, %c0_186] : memref<9x8x8xbf16, #tpu.memory_space<vmem>>, vector<1x8x8xbf16>
    %198 = vector.shape_cast %197 : vector<1x8x8xbf16> to vector<8x8xbf16>
    %cst_187 = arith.constant dense<0.000000e+00> : vector<64x8xf32>
    %199 = tpu.matmul %196, %198, %cst_187 {dimension_numbers = #tpu.dot_dimension_numbers<[1], [0], [0], [1], [0, 0, 1, 1], [], []>} : vector<64x8xbf16>, vector<8x8xbf16>, vector<64x8xf32> -> vector<64x8xf32>
    %200 = arith.addf %193, %199 : vector<64x8xf32>
    %c2_188 = arith.constant 2 : index
    %c0_189 = arith.constant 0 : index
    %c0_190 = arith.constant 0 : index
    %201 = vector.load %arg10[%c2_188, %c0_189, %c0_190] : memref<10x10x8xf32, #tpu.memory_space<vmem>>, vector<8x8x8xf32>
    %202 = vector.shape_cast %201 : vector<8x8x8xf32> to vector<64x8xf32>
    %203 = arith.truncf %202 : vector<64x8xf32> to vector<64x8xbf16>
    %c6_191 = arith.constant 6 : index
    %c0_192 = arith.constant 0 : index
    %c0_193 = arith.constant 0 : index
    %204 = vector.load %arg6[%c6_191, %c0_192, %c0_193] : memref<9x8x8xbf16, #tpu.memory_space<vmem>>, vector<1x8x8xbf16>
    %205 = vector.shape_cast %204 : vector<1x8x8xbf16> to vector<8x8xbf16>
    %cst_194 = arith.constant dense<0.000000e+00> : vector<64x8xf32>
    %206 = tpu.matmul %203, %205, %cst_194 {dimension_numbers = #tpu.dot_dimension_numbers<[1], [0], [0], [1], [0, 0, 1, 1], [], []>} : vector<64x8xbf16>, vector<8x8xbf16>, vector<64x8xf32> -> vector<64x8xf32>
    %207 = arith.addf %200, %206 : vector<64x8xf32>
    %c2_195 = arith.constant 2 : index
    %c1_196 = arith.constant 1 : index
    %c0_197 = arith.constant 0 : index
    %208 = vector.load %arg10[%c2_195, %c1_196, %c0_197] : memref<10x10x8xf32, #tpu.memory_space<vmem>>, vector<8x8x8xf32>
    %209 = vector.shape_cast %208 : vector<8x8x8xf32> to vector<64x8xf32>
    %210 = arith.truncf %209 : vector<64x8xf32> to vector<64x8xbf16>
    %c7_198 = arith.constant 7 : index
    %c0_199 = arith.constant 0 : index
    %c0_200 = arith.constant 0 : index
    %211 = vector.load %arg6[%c7_198, %c0_199, %c0_200] : memref<9x8x8xbf16, #tpu.memory_space<vmem>>, vector<1x8x8xbf16>
    %212 = vector.shape_cast %211 : vector<1x8x8xbf16> to vector<8x8xbf16>
    %cst_201 = arith.constant dense<0.000000e+00> : vector<64x8xf32>
    %213 = tpu.matmul %210, %212, %cst_201 {dimension_numbers = #tpu.dot_dimension_numbers<[1], [0], [0], [1], [0, 0, 1, 1], [], []>} : vector<64x8xbf16>, vector<8x8xbf16>, vector<64x8xf32> -> vector<64x8xf32>
    %214 = arith.addf %207, %213 : vector<64x8xf32>
    %c2_202 = arith.constant 2 : index
    %c2_203 = arith.constant 2 : index
    %c0_204 = arith.constant 0 : index
    %215 = vector.load %arg10[%c2_202, %c2_203, %c0_204] : memref<10x10x8xf32, #tpu.memory_space<vmem>>, vector<8x8x8xf32>
    %216 = vector.shape_cast %215 : vector<8x8x8xf32> to vector<64x8xf32>
    %217 = arith.truncf %216 : vector<64x8xf32> to vector<64x8xbf16>
    %c8_205 = arith.constant 8 : index
    %c0_206 = arith.constant 0 : index
    %c0_207 = arith.constant 0 : index
    %218 = vector.load %arg6[%c8_205, %c0_206, %c0_207] : memref<9x8x8xbf16, #tpu.memory_space<vmem>>, vector<1x8x8xbf16>
    %219 = vector.shape_cast %218 : vector<1x8x8xbf16> to vector<8x8xbf16>
    %cst_208 = arith.constant dense<0.000000e+00> : vector<64x8xf32>
    %220 = tpu.matmul %217, %219, %cst_208 {dimension_numbers = #tpu.dot_dimension_numbers<[1], [0], [0], [1], [0, 0, 1, 1], [], []>} : vector<64x8xbf16>, vector<8x8xbf16>, vector<64x8xf32> -> vector<64x8xf32>
    %221 = arith.addf %214, %220 : vector<64x8xf32>
    %c0_209 = arith.constant 0 : index
    %c0_210 = arith.constant 0 : index
    %222 = vector.load %arg7[%c0_209, %c0_210] : memref<1x8xf32, #tpu.memory_space<vmem>>, vector<1x8xf32>
    %223 = vector.broadcast %222 : vector<1x8xf32> to vector<64x8xf32>
    %224 = arith.addf %221, %223 : vector<64x8xf32>
    %cst_211 = arith.constant 0.000000e+00 : f32
    %225 = vector.broadcast %cst_211 : f32 to vector<64x8xf32>
    %226 = arith.maximumf %224, %225 : vector<64x8xf32>
    %c0_212 = arith.constant 0 : index
    %c0_213 = arith.constant 0 : index
    %c0_214 = arith.constant 0 : index
    %227 = vector.load %arg8[%c0_212, %c0_213, %c0_214] : memref<1x64x8xf32, #tpu.memory_space<vmem>>, vector<1x64x8xf32>
    %228 = vector.shape_cast %227 : vector<1x64x8xf32> to vector<64x8xf32>
    %229 = vector.shape_cast %226 : vector<64x8xf32> to vector<1x64x8xf32>
    tpu.vector_store %arg8[%c0_212, %c0_213, %c0_214], %229 {strides = array<i32>} : memref<1x64x8xf32, #tpu.memory_space<vmem>>, vector<1x64x8xf32>,
    return
  }
  func.func @transform_0(%arg0: i32) -> (i32, i32, i32, i32) {
    %c0_i32 = arith.constant 0 : i32
    %c0_i32_0 = arith.constant 0 : i32
    %c0_i32_1 = arith.constant 0 : i32
    %c0_i32_2 = arith.constant 0 : i32
    return %arg0, %c0_i32, %c0_i32_0, %c0_i32_1 : i32, i32, i32, i32
  }
  func.func @transform_1(%arg0: i32) -> (i32, i32, i32) {
    %c0_i32 = arith.constant 0 : i32
    %c0_i32_0 = arith.constant 0 : i32
    %c0_i32_1 = arith.constant 0 : i32
    %c0_i32_2 = arith.constant 0 : i32
    return %c0_i32, %c0_i32_0, %c0_i32_1 : i32, i32, i32
  }
  func.func @transform_2(%arg0: i32) -> (i32, i32) {
    %c0_i32 = arith.constant 0 : i32
    %c0_i32_0 = arith.constant 0 : i32
    %c0_i32_1 = arith.constant 0 : i32
    return %c0_i32, %c0_i32_0 : i32, i32
  }
  func.func @transform_3(%arg0: i32) -> (i32, i32, i32) {
    %c0_i32 = arith.constant 0 : i32
    %c0_i32_0 = arith.constant 0 : i32
    %c0_i32_1 = arith.constant 0 : i32
    %c0_i32_2 = arith.constant 0 : i32
    return %c0_i32, %c0_i32_0, %c0_i32_1 : i32, i32, i32
  }
  func.func @transform_4(%arg0: i32) -> (i32, i32) {
    %c0_i32 = arith.constant 0 : i32
    %c0_i32_0 = arith.constant 0 : i32
    %c0_i32_1 = arith.constant 0 : i32
    return %c0_i32, %c0_i32_0 : i32, i32
  }
  func.func @transform_5(%arg0: i32) -> (i32, i32, i32) {
    %c0_i32 = arith.constant 0 : i32
    %c0_i32_0 = arith.constant 0 : i32
    %c0_i32_1 = arith.constant 0 : i32
    %c0_i32_2 = arith.constant 0 : i32
    return %c0_i32, %c0_i32_0, %c0_i32_1 : i32, i32, i32
  }
  func.func @transform_6(%arg0: i32) -> (i32, i32) {
    %c0_i32 = arith.constant 0 : i32
    %c0_i32_0 = arith.constant 0 : i32
    %c0_i32_1 = arith.constant 0 : i32
    return %c0_i32, %c0_i32_0 : i32, i32
  }
  func.func @transform_7(%arg0: i32) -> (i32, i32, i32) {
    %c0_i32 = arith.constant 0 : i32
    %c0_i32_0 = arith.constant 0 : i32
    %c0_i32_1 = arith.constant 0 : i32
    return %arg0, %c0_i32, %c0_i32_0 : i32, i32, i32
  }
}

</mosaic_0001>

<bundles_post_ra>
// kernel: tpu_custom_call.1
= control target key start
LH: loop header
LB: loop body
LE: loop exit
PB: predicated region body
PF: predicated region fallthrough
CT: control target
= control target key end

     0   :  { %s3936_s24 = smov 0   ;;  %s4652_s0 = inlined_call_operand.vmem [shape: f32[2,16,8,8], index: 0, kind: input, shape index: {}]   ;;  %s4653_s1 = inlined_call_operand.vmem [shape: bf16[9,4,8], index: 1, kind: input, shape index: {}]   ;;  %s4654_s2 = inlined_call_operand.vmem [shape: f32[1,8], index: 2, kind: input, shape index: {}]   ;;  %s4655_s3 = inlined_call_operand.vmem [shape: bf16[9,8,8], index: 3, kind: input, shape index: {}]   ;;  %s4656_s4 = inlined_call_operand.vmem [shape: f32[1,8], index: 4, kind: input, shape index: {}]   ;;  %s4657_s5 = inlined_call_operand.vmem [shape: bf16[9,8,8], index: 5, kind: input, shape index: {}]   ;;  %s4658_s6 = inlined_call_operand.vmem [shape: f32[1,8], index: 6, kind: input, shape index: {}]   ;;  %s4659_s7 = inlined_call_operand.vmem [shape: f32[2,64,8], index: 7, kind: output, shape index: {}]  }
   0x1 LB: > { %s3293_s25 = sadd.s32 4294967295, %s3892_s24   ;;  %p3297_p0 = scmp.ge.s32.totalorder %s3892_s24, 1  ;;  %s3892_s24 = sphi %s3936_s24, %s17_s24  }
   0x2   : > { %p237_p1 = scmp.lt.s32.totalorder %s3892_s24, 3 }
   0x4   : > { %p238_p2 = pnand %p3297_p0, %p237_p1 }
   0x6   : > { %241 = sbr.rel (%p238_p2) target bundleno = 998 (0x3e6), region = 48 }
   0xb   : > { %p3944_p3 = scmp.lt.s32.totalorder %s3293_s25, 1  ;;  %vm280_vm0 = vcmask 31744   ;;  %vm282_vm1 = vcmask 25600   ;;  %v3894_v0 = vmov 0.0   ;;  %s3895_s8 = smov 124   ;;  %vm476_vm2 = vcmask 1041408  }
   0xc   : > { %292 = vst.msk [vmem:[#allocation2 + $0x50] sm:$0xff] %vm280_vm0, %v3894_v0  ;;  %281 = vst.msk [vmem:[#allocation2] sm:$0xff] %vm280_vm0, %v3894_v0  ;;  %v3302_v7 = vld [vmem:[%s4653_s1 + $0x2] sm:$0x3]  ;;  %v449_v15 = vld [vmem:[%s4653_s1] sm:$0x3] }
   0xd   : > { %293 = vst.msk [vmem:[#allocation2 + $0x58] sm:$0x3] %vm282_vm1, %v3894_v0  ;;  %283 = vst.msk [vmem:[#allocation2 + $0x8] sm:$0x3] %vm282_vm1, %v3894_v0  ;;  %s4710_s25 = smov (!%p3944_p3, %s3293_s25), 1  ;;  %3849 = vmatprep.subr.msk.bf16.mxu1 %vm476_vm2, %v3302_v7  ;;  %v478_v10 = vsel %vm476_vm2, %v3302_v7, 0  ;;  %3848 = vmatprep.subr.msk.bf16.mxu0 %vm476_vm2, %v3302_v7 }
   0xe   : > { %284 = vst.msk [vmem:[#allocation2 + $0x10] sm:$0xff] %vm280_vm0, %v3894_v0  ;;  %286 = vst.msk [vmem:[#allocation2 + $0x20] sm:$0xff] %vm280_vm0, %v3894_v0  ;;  %s3439_s27 = sshll.u32 %s4710_s25, 7  ;;  %3847 = vmatpush3.bf16.msra.mxu1 %v478_v10  ;;  %3577 = vmatpush3.bf16.msra.mxu0 %v478_v10  ;;  %v4032_v16 = vld [vmem:[%s4653_s1 + $0x4] sm:$0x3]  ;;  %v558_v61 = vsel %vm476_vm2, %v449_v15, 0 }
   0xf   : > { %285 = vst.msk [vmem:[#allocation2 + $0x18] sm:$0x3] %vm282_vm1, %v3894_v0  ;;  %287 = vst.msk [vmem:[#allocation2 + $0x28] sm:$0x3] %vm282_vm1, %v3894_v0  ;;  %s3996_s30 = scalar_lea.vmem %s4652_s0, %s3439_s27  ;;  %3850 = vmatprep.subr.msk.bf16.mxu1 %vm476_vm2, %v449_v15  ;;  %3851 = vmatprep.subr.msk.bf16.mxu0 %vm476_vm2, %v4032_v16  ;;  %vm302_vm3 = vcmask 64512   ;;  %vm304_vm4 = vcmask 58368  }
  0x10   : > { %288 = vst.msk [vmem:[#allocation2 + $0x30] sm:$0xff] %vm280_vm0, %v3894_v0  ;;  %290 = vst.msk [vmem:[#allocation2 + $0x40] sm:$0xff] %vm280_vm0, %v3894_v0  ;;  %v332_v1 = vld [vmem:[%s3996_s30 + $0x40] sm:$0xff]  ;;  %v330_v2 = vld [vmem:[%s3996_s30 + $0x30] sm:$0xff]  ;;  %vm1411_vm5 = vcmask 1043456   ;;  %s3440_s29 = sshll.u32 %s4710_s25, 6 }
  0x11   : > { %289 = vst.msk [vmem:[#allocation2 + $0x38] sm:$0x3] %vm282_vm1, %v3894_v0  ;;  %291 = vst.msk [vmem:[#allocation2 + $0x48] sm:$0x3] %vm282_vm1, %v3894_v0  ;;  %372 = vrot.lane.b32.xlu1 %v332_v1, %s3895_s8  ;;  %368 = vrot.lane.b32.xlu0 %v330_v2, %s3895_s8  ;;  %v333_v3 = vld [vmem:[%s3996_s30 + $0x48] sm:$0xff]  ;;  %v331_v4 = vld [vmem:[%s3996_s30 + $0x38] sm:$0xff]  ;;  %s4630_s9 = scalar_lea.vmem %s4659_s7, %s3440_s29 }
  0x12   : > { %294 = vst.msk [vmem:[#allocation2 + $0x60] sm:$0xff] %vm280_vm0, %v3894_v0  ;;  %296 = vst.msk [vmem:[#allocation2 + $0x70] sm:$0xff] %vm280_vm0, %v3894_v0  ;;  %v335_v5 = vld [vmem:[%s3996_s30 + $0x58] sm:$0xff]  ;;  %v334_v6 = vld [vmem:[%s3996_s30 + $0x50] sm:$0xff] }
  0x13   : > { %295 = vst.msk [vmem:[#allocation2 + $0x68] sm:$0x3] %vm282_vm1, %v3894_v0  ;;  %297 = vst.msk [vmem:[#allocation2 + $0x78] sm:$0x3] %vm282_vm1, %v3894_v0  ;;  %v337_v8 = vld [vmem:[%s3996_s30 + $0x68] sm:$0xff]  ;;  %v336_v9 = vld [vmem:[%s3996_s30 + $0x60] sm:$0xff] }
  0x14   : > { %298 = vst.msk [vmem:[#allocation2 + $0x80] sm:$0xff] %vm280_vm0, %v3894_v0  ;;  %300 = vst.msk [vmem:[#allocation2 + $0x90] sm:$0xff] %vm280_vm0, %v3894_v0  ;;  %v325_v11 = vld [vmem:[%s3996_s30 + $0x8] sm:$0xff]  ;;  %v324_v12 = vld [vmem:[%s3996_s30] sm:$0xff] }
  0x15   : > { %299 = vst.msk [vmem:[#allocation2 + $0x88] sm:$0x3] %vm282_vm1, %v3894_v0  ;;  %301 = vst.msk [vmem:[#allocation2 + $0x98] sm:$0x3] %vm282_vm1, %v3894_v0  ;;  %374 = vrot.lane.b32.xlu1 %v333_v3, %s3895_s8  ;;  %370 = vrot.lane.b32.xlu0 %v331_v4, %s3895_s8  ;;  %v327_v13 = vld [vmem:[%s3996_s30 + $0x18] sm:$0xff]  ;;  %v326_v14 = vld [vmem:[%s3996_s30 + $0x10] sm:$0xff] }
  0x16   : > { %v329_v17 = vld [vmem:[%s3996_s30 + $0x28] sm:$0xff]  ;;  %v328_v18 = vld [vmem:[%s3996_s30 + $0x20] sm:$0xff]  ;;  %v4044_v19 = vld [vmem:[%s3996_s30 + $0x78] sm:$0xff]  ;;  %310 = vst.msk [vmem:[#allocation3 + $0x30] sm:$0xff] %vm302_vm3, %v3894_v0 }
  0x17   : > { %v4047_v20 = vld [vmem:[%s3996_s30 + $0x70] sm:$0xff]  ;;  %v450_v62 = vld [vmem:[#allocation2 + $0x1] sm:$0xff]  ;;  %311 = vst.msk [vmem:[#allocation3 + $0x38] sm:$0x3] %vm304_vm4, %v3894_v0  ;;  %305 = vst.msk [vmem:[#allocation3 + $0x8] sm:$0x3] %vm304_vm4, %v3894_v0 }
  0x18   : > { %v437_v63 = vld [vmem:[#allocation2] sm:$0xff]  ;;  %303 = vst.msk [vmem:[#allocation3] sm:$0xff] %vm302_vm3, %v3894_v0  ;;  %306 = vst.msk [vmem:[#allocation3 + $0x10] sm:$0xff] %vm302_vm3, %v3894_v0 }
  0x19   : > { %378 = vrot.lane.b32.xlu1 %v335_v5, %s3895_s8  ;;  %376 = vrot.lane.b32.xlu0 %v334_v6, %s3895_s8  ;;  %307 = vst.msk [vmem:[#allocation3 + $0x18] sm:$0x3] %vm304_vm4, %v3894_v0  ;;  %309 = vst.msk [vmem:[#allocation3 + $0x28] sm:$0x3] %vm304_vm4, %v3894_v0 }
  0x1a   : > { %308 = vst.msk [vmem:[#allocation3 + $0x20] sm:$0xff] %vm302_vm3, %v3894_v0  ;;  %312 = vst.msk [vmem:[#allocation3 + $0x40] sm:$0xff] %vm302_vm3, %v3894_v0 }
  0x1b   : > { %313 = vst.msk [vmem:[#allocation3 + $0x48] sm:$0x3] %vm304_vm4, %v3894_v0  ;;  %315 = vst.msk [vmem:[#allocation3 + $0x58] sm:$0x3] %vm304_vm4, %v3894_v0 }
  0x1c   : > { %314 = vst.msk [vmem:[#allocation3 + $0x50] sm:$0xff] %vm302_vm3, %v3894_v0  ;;  %316 = vst.msk [vmem:[#allocation3 + $0x60] sm:$0xff] %vm302_vm3, %v3894_v0 }
  0x1d   : > { %382 = vrot.lane.b32.xlu1 %v337_v8, %s3895_s8  ;;  %380 = vrot.lane.b32.xlu0 %v336_v9, %s3895_s8  ;;  %317 = vst.msk [vmem:[#allocation3 + $0x68] sm:$0x3] %vm304_vm4, %v3894_v0  ;;  %319 = vst.msk [vmem:[#allocation3 + $0x78] sm:$0x3] %vm304_vm4, %v3894_v0 }
  0x1e   : > { %318 = vst.msk [vmem:[#allocation3 + $0x70] sm:$0xff] %vm302_vm3, %v3894_v0  ;;  %320 = vst.msk [vmem:[#allocation3 + $0x80] sm:$0xff] %vm302_vm3, %v3894_v0 }
  0x1f   : > { %321 = vst.msk [vmem:[#allocation3 + $0x88] sm:$0x3] %vm304_vm4, %v3894_v0  ;;  %323 = vst.msk [vmem:[#allocation3 + $0x98] sm:$0x3] %vm304_vm4, %v3894_v0 }
  0x20   : > { %322 = vst.msk [vmem:[#allocation3 + $0x90] sm:$0xff] %vm302_vm3, %v3894_v0  ;;  %v4233_v0 = vld [vmem:[%s4655_s3 + $0x8] sm:$0xf] }
  0x21   : > { %358 = vrot.lane.b32.xlu1 %v325_v11, %s3895_s8  ;;  %356 = vrot.lane.b32.xlu0 %v324_v12, %s3895_s8  ;;  %4671 = vst [vmem:[#allocation4_spill] sm:$0xff] %v4233_v0 }
  0x25   : > { %362 = vrot.lane.b32.xlu1 %v327_v13, %s3895_s8  ;;  %360 = vrot.lane.b32.xlu0 %v326_v14, %s3895_s8 }
  0x29   : > { %366 = vrot.lane.b32.xlu1 %v329_v17, %s3895_s8  ;;  %364 = vrot.lane.b32.xlu0 %v328_v18, %s3895_s8 }
  0x2d   : > { %386 = vrot.lane.b32.xlu1 %v4044_v19, %s3895_s8  ;;  %384 = vrot.lane.b32.xlu0 %v4047_v20, %s3895_s8 }
  0x83   : > { %v373_v21 = vpop.permute.xlu1 %372  ;;  %v369_v22 = vpop.permute.xlu0 %368 }
  0x84   : > { %v412_v25 = vmax.f32 %v332_v1, %v373_v21  ;;  %v410_v26 = vmax.f32 %v330_v2, %v369_v22  ;;  %v3316_v1 = vld [vmem:[%s4653_s1 + $0x6] sm:$0x3] }
  0x87   : > { %v375_v23 = vpop.permute.xlu1 %374  ;;  %v371_v24 = vpop.permute.xlu0 %370 }
  0x88   : > { %v413_v27 = vmax.f32 %v333_v3, %v375_v23  ;;  %v411_v28 = vmax.f32 %v331_v4, %v371_v24  ;;  %v652_v23 = vsel %vm476_vm2, %v4032_v16, 0  ;;  %v3326_v16 = vld [vmem:[%s4653_s1 + $0xa] sm:$0x3] }
  0x8a   : > { %v424_v29 = vmax.f32 %v412_v25, %v413_v27  ;;  %v423_v30 = vmax.f32 %v410_v26, %v411_v28  ;;  %v754_v25 = vsel %vm476_vm2, %v3316_v1, 0  ;;  %v3321_v27 = vld [vmem:[%s4653_s1 + $0x8] sm:$0x3] }
  0x8b   : > { %v379_v31 = vpop.permute.xlu1 %378  ;;  %v377_v32 = vpop.permute.xlu0 %376 }
  0x8c   : > { %433 = vst.msk [vmem:[#allocation2 + $0x51] sm:$0xff] %vm280_vm0, %v424_v29  ;;  %432 = vst.msk [vmem:[#allocation2 + $0x41] sm:$0xff] %vm280_vm0, %v423_v30  ;;  %v415_v33 = vmax.f32 %v335_v5, %v379_v31  ;;  %v414_v34 = vmax.f32 %v334_v6, %v377_v32 }
  0x8e   : > { %v425_v35 = vmax.f32 %v414_v34, %v415_v33 }
  0x8f   : > { %v383_v36 = vpop.permute.xlu1 %382  ;;  %v381_v37 = vpop.permute.xlu0 %380 }
  0x90   : > { %434 = vst.msk [vmem:[#allocation2 + $0x61] sm:$0xff] %vm280_vm0, %v425_v35  ;;  %v417_v38 = vmax.f32 %v337_v8, %v383_v36  ;;  %v416_v39 = vmax.f32 %v336_v9, %v381_v37  ;;  %v856_v36 = vsel %vm476_vm2, %v3321_v27, 0 }
  0x92   : > { %v426_v40 = vmax.f32 %v416_v39, %v417_v38  ;;  %v3331_v38 = vld [vmem:[%s4653_s1 + $0xc] sm:$0x3] }
  0x93   : > { %v359_v41 = vpop.permute.xlu1 %358  ;;  %v357_v42 = vpop.permute.xlu0 %356  ;;  %v4056_v43 = vld [vmem:[#allocation2 + $0x41] sm:$0xff]  ;;  %v4058_v44 = vld [vmem:[#allocation2 + $0x51] sm:$0xff] }
  0x94   : > { %435 = vst.msk [vmem:[#allocation2 + $0x71] sm:$0xff] %vm280_vm0, %v426_v40  ;;  %v405_v45 = vmax.f32 %v325_v11, %v359_v41  ;;  %v404_v46 = vmax.f32 %v324_v12, %v357_v42  ;;  %v4063_v47 = vpack.c.bf16 %v4058_v44, %v4056_v43  ;;  %v441_v12 = vld [vmem:[#allocation2 + $0x40] sm:$0xff]  ;;  %v442_v15 = vld [vmem:[#allocation2 + $0x50] sm:$0xff] }
  0x95   : > { %v4101_v24 = vpack.c.bf16 %v442_v15, %v441_v12  ;;  %v629_v30 = vld [vmem:[#allocation2 + $0x42] sm:$0xff]  ;;  %v630_v31 = vld [vmem:[#allocation2 + $0x52] sm:$0xff] }
  0x96   : > { %v420_v48 = vmax.f32 %v404_v46, %v405_v45  ;;  %3582 = vmatprep.mubr.msk.bf16.mxu1 %vm280_vm0, %v4063_v47  ;;  %v4121_v37 = vpack.c.bf16 %v630_v31, %v629_v30 }
  0x97   : > { %v363_v49 = vpop.permute.xlu1 %362  ;;  %v361_v50 = vpop.permute.xlu0 %360  ;;  %v4068_v56 = vld [vmem:[#allocation2 + $0x61] sm:$0xff] }
  0x98   : > { %429 = vst.msk [vmem:[#allocation2 + $0x11] sm:$0xff] %vm280_vm0, %v420_v48  ;;  %v407_v51 = vmax.f32 %v327_v13, %v363_v49  ;;  %v406_v52 = vmax.f32 %v326_v14, %v361_v50  ;;  %v625_v13 = vld [vmem:[#allocation2 + $0x2] sm:$0xff]  ;;  %v958_v49 = vsel %vm476_vm2, %v3326_v16, 0  ;;  %v3336_v50 = vld [vmem:[%s4653_s1 + $0xe] sm:$0x3] }
  0x99   : > { %v443_v32 = vld [vmem:[#allocation2 + $0x60] sm:$0xff] }
  0x9a   : > { %v421_v53 = vmax.f32 %v406_v52, %v407_v51  ;;  %v631_v41 = vld [vmem:[#allocation2 + $0x62] sm:$0xff]  ;;  %v737_v46 = vpack.c.bf16 %v443_v32, %v442_v15 }
  0x9b   : > { %v367_v54 = vpop.permute.xlu1 %366  ;;  %v365_v55 = vpop.permute.xlu0 %364  ;;  %v4070_v57 = vld [vmem:[#allocation2 + $0x71] sm:$0xff] }
  0x9c   : > { %430 = vst.msk [vmem:[#allocation2 + $0x21] sm:$0xff] %vm280_vm0, %v421_v53  ;;  %v409_v58 = vmax.f32 %v329_v17, %v367_v54  ;;  %v408_v59 = vmax.f32 %v328_v18, %v365_v55  ;;  %v4075_v60 = vpack.c.bf16 %v4070_v57, %v4068_v56  ;;  %v444_v28 = vld [vmem:[#allocation2 + $0x70] sm:$0xff]  ;;  %v1061_v54 = vsel %vm476_vm2, %v3331_v38, 0 }
  0x9d   : > { %v448_v34 = vpack.c.bf16 %v444_v28, %v443_v32  ;;  %v632_v40 = vld [vmem:[#allocation2 + $0x72] sm:$0xff]  ;;  %v839_v55 = vpack.c.bf16 %v4068_v56, %v4058_v44 }
  0x9e   : > { %v422_v2 = vmax.f32 %v408_v59, %v409_v58  ;;  %3583 = vmatmul.mubr.msk.bf16.vlgmr.msra.gmra.mxu1 %vm280_vm0, %v4075_v60  ;;  %v636_v42 = vpack.c.bf16 %v632_v40, %v631_v41  ;;  %v3341_v58 = vld [vmem:[%s4653_s1 + $0x10] sm:$0x3] }
  0x9f   : > { %v387_v3 = vpop.permute.xlu1 %386  ;;  %v385_v4 = vpop.permute.xlu0 %384  ;;  %v4083_v5 = vld [vmem:[#allocation2 + $0x11] sm:$0xff]  ;;  %3587 = vmatpush3.bf16.msra.mxu1 %v558_v61  ;;  %v941_v61 = vpack.c.bf16 %v631_v41, %v630_v31 }
  0xa0   : > { %v438_v6 = vld [vmem:[#allocation2 + $0x10] sm:$0xff]  ;;  %431 = vst.msk [vmem:[#allocation2 + $0x31] sm:$0xff] %vm280_vm0, %v422_v2  ;;  %v419_v7 = vmax.f32 %v4044_v19, %v387_v3  ;;  %v418_v8 = vmax.f32 %v4047_v20, %v385_v4  ;;  %v458_v9 = vpack.c.bf16 %v4083_v5, %v450_v62  ;;  %3852 = vmatprep.subr.msk.bf16.mxu1 %vm476_vm2, %v3316_v1  ;;  %v1163_v62 = vsel %vm476_vm2, %v3336_v50, 0 }
  0xa1   : > { %v445_v10 = vpack.c.bf16 %v438_v6, %v437_v63  ;;  %v4093_v17 = vld [vmem:[#allocation2 + $0x12] sm:$0xff]  ;;  %v1265_v2 = vsel %vm476_vm2, %v3341_v58, 0 }
  0xa2   : > { %v427_v11 = vmax.f32 %v418_v8, %v419_v7  ;;  %3578 = vmatprep.mubr.msk.bf16.mxu0 %vm280_vm0, %v458_v9  ;;  %v633_v26 = vpack.c.bf16 %v4093_v17, %v625_v13  ;;  %v1143_v4 = vld [vmem:[#allocation2 + $0x91] sm:$0xff]  ;;  %v1384_v8 = vld [vmem:[%s4655_s3] sm:$0xf] }
  0xa3   : > { %3588 = vmatprep.mubr.msk.bf16.mxu1 %vm280_vm0, %v445_v10  ;;  %v452_v14 = vld [vmem:[#allocation2 + $0x21] sm:$0xff]  ;;  %v1493_v9 = vsel %vm1411_vm5, %v1384_v8, 0  ;;  %v4240_v10 = vld [vmem:[%s4655_s3 + $0xc] sm:$0xf] }
  0xa4   : > { %436 = vst.msk [vmem:[#allocation2 + $0x81] sm:$0xff] %vm280_vm0, %v427_v11  ;;  %v439_v19 = vld [vmem:[#allocation2 + $0x20] sm:$0xff]  ;;  %v837_v48 = vpack.c.bf16 %v452_v14, %v4083_v5  ;;  %4672 = vst [vmem:[#allocation5_spill] sm:$0xff] %v4240_v10 }
  0xa5   : > { %v627_v33 = vld [vmem:[#allocation2 + $0x22] sm:$0xff]  ;;  %v735_v39 = vpack.c.bf16 %v439_v19, %v438_v6  ;;  %v1245_v6 = vld [vmem:[#allocation2 + $0x92] sm:$0xff] }
  0xa6   : > { %v939_v59 = vpack.c.bf16 %v627_v33, %v4093_v17 }
  0xa7   : > { %v453_v18 = vld [vmem:[#allocation2 + $0x31] sm:$0xff] }
  0xa8   : > { %v440_v20 = vld [vmem:[#allocation2 + $0x30] sm:$0xff]  ;;  %v4095_v21 = vpack.c.bf16 %v453_v18, %v452_v14  ;;  %v838_v53 = vpack.c.bf16 %v4056_v43, %v453_v18 }
  0xa9   : > { %v4097_v22 = vpack.c.bf16 %v440_v20, %v439_v19  ;;  %v628_v29 = vld [vmem:[#allocation2 + $0x32] sm:$0xff]  ;;  %v736_v45 = vpack.c.bf16 %v441_v12, %v440_v20 }
  0xaa   : > { %3579 = vmatmul.mubr.msk.bf16.vlgmr.msra.gmra.mxu0 %vm280_vm0, %v4095_v21  ;;  %v634_v35 = vpack.c.bf16 %v628_v29, %v627_v33  ;;  %v940_v56 = vpack.c.bf16 %v629_v30, %v628_v29 }
  0xab   : > { %3589 = vmatmul.mubr.msk.bf16.vlgmr.msra.gmra.mxu1 %vm280_vm0, %v4097_v22  ;;  %3597 = vmatpush3.bf16.msra.mxu0 %v652_v23  ;;  %v734_v51 = vld [vmem:[#allocation2 + $0x80] sm:$0xff] }
  0xac   : > { %3592 = vmatprep.mubr.msk.bf16.mxu1 %vm280_vm0, %v4101_v24  ;;  %3598 = vmatprep.mubr.msk.bf16.mxu0 %vm280_vm0, %v633_v26  ;;  %v738_v52 = vpack.c.bf16 %v734_v51, %v444_v28  ;;  %v836_v43 = vld [vmem:[#allocation2 + $0x81] sm:$0xff] }
  0xad   : > { %3607 = vmatpush3.bf16.msra.mxu1 %v754_v25  ;;  %3853 = vmatprep.subr.msk.bf16.mxu0 %vm476_vm2, %v3321_v27  ;;  %v840_v44 = vpack.c.bf16 %v836_v43, %v4070_v57  ;;  %v938_v63 = vld [vmem:[#allocation2 + $0x82] sm:$0xff]  ;;  %v1041_v57 = vld [vmem:[#allocation2 + $0x90] sm:$0xff]  ;;  %v1147_v5 = vpack.c.bf16 %v1143_v4, %v836_v43 }
  0xae   : > { %3854 = vmatprep.subr.msk.bf16.mxu1 %vm476_vm2, %v3326_v16  ;;  %v942_v1 = vpack.c.bf16 %v938_v63, %v632_v40  ;;  %v1045_v3 = vpack.c.bf16 %v1041_v57, %v734_v51  ;;  %v1249_v7 = vpack.c.bf16 %v1245_v6, %v938_v63 }
  0xb2   : > { %3599 = vmatmul.mubr.msk.bf16.vlgmr.msra.gmra.mxu0 %vm280_vm0, %v634_v35 }
  0xb3   : > { %3593 = vmatmul.mubr.msk.bf16.gmra.mxu1 %vm280_vm0, %v448_v34  ;;  %3617 = vmatpush3.bf16.msra.mxu0 %v856_v36 }
  0xb4   : > { %3602 = vmatprep.mubr.msk.bf16.mxu0 %vm280_vm0, %v4121_v37  ;;  %3608 = vmatprep.mubr.msk.bf16.mxu1 %vm280_vm0, %v735_v39 }
  0xb5   : > { %3855 = vmatprep.subr.msk.bf16.mxu0 %vm476_vm2, %v3331_v38 }
  0xba   : > { %3603 = vmatmul.mubr.msk.bf16.gmra.mxu0 %vm280_vm0, %v636_v42 }
  0xbb   : > { %3609 = vmatmul.mubr.msk.bf16.vlgmr.msra.gmra.mxu1 %vm280_vm0, %v736_v45  ;;  %3618 = vmatprep.mubr.msk.bf16.mxu0 %vm280_vm0, %v837_v48 }
  0xbc   : > { %3612 = vmatprep.mubr.msk.bf16.mxu1 %vm280_vm0, %v737_v46  ;;  %3627 = vmatpush3.bf16.msra.mxu1 %v958_v49 }
  0xbd   : > { %3856 = vmatprep.subr.msk.bf16.mxu1 %vm476_vm2, %v3336_v50 }
  0xc2   : > { %3619 = vmatmul.mubr.msk.bf16.vlgmr.msra.gmra.mxu0 %vm280_vm0, %v838_v53 }
  0xc3   : > { %3613 = vmatmul.mubr.msk.bf16.gmra.mxu1 %vm280_vm0, %v738_v52  ;;  %3637 = vmatpush3.bf16.msra.mxu0 %v1061_v54 }
  0xc4   : > { %3622 = vmatprep.mubr.msk.bf16.mxu0 %vm280_vm0, %v839_v55  ;;  %3628 = vmatprep.mubr.msk.bf16.mxu1 %vm280_vm0, %v939_v59 }
  0xc5   : > { %3857 = vmatprep.subr.msk.bf16.mxu0 %vm476_vm2, %v3341_v58 }
  0xca   : > { %3623 = vmatmul.mubr.msk.bf16.gmra.mxu0 %vm280_vm0, %v840_v44 }
  0xcb   : > { %3629 = vmatmul.mubr.msk.bf16.vlgmr.msra.gmra.mxu1 %vm280_vm0, %v940_v56  ;;  %3638 = vmatprep.mubr.msk.bf16.mxu0 %vm280_vm0, %v4097_v22 }
  0xcc   : > { %3632 = vmatprep.mubr.msk.bf16.mxu1 %vm280_vm0, %v941_v61  ;;  %3647 = vmatpush3.bf16.msra.mxu1 %v1163_v62 }
  0xd2   : > { %3639 = vmatmul.mubr.msk.bf16.vlgmr.msra.gmra.mxu0 %vm280_vm0, %v4101_v24 }
  0xd3   : > { %3633 = vmatmul.mubr.msk.bf16.gmra.mxu1 %vm280_vm0, %v942_v1  ;;  %3657 = vmatpush3.bf16.msra.mxu0 %v1265_v2 }
  0xd4   : > { %3642 = vmatprep.mubr.msk.bf16.mxu0 %vm280_vm0, %v448_v34  ;;  %3648 = vmatprep.mubr.msk.bf16.mxu1 %vm280_vm0, %v4095_v21 }
  0xd5   : > { %3859 = vmatprep.subr.msk.bf16.mxu0 %vm1411_vm5, %v1384_v8 }
  0xda   : > { %3643 = vmatmul.mubr.msk.bf16.gmra.mxu0 %vm280_vm0, %v1045_v3 }
  0xdb   : > { %3649 = vmatmul.mubr.msk.bf16.vlgmr.msra.gmra.mxu1 %vm280_vm0, %v4063_v47  ;;  %3658 = vmatprep.mubr.msk.bf16.mxu0 %vm280_vm0, %v634_v35  ;;  %v3347_v47 = vld [vmem:[%s4655_s3 + $0x4] sm:$0xf] }
  0xdc   : > { %3652 = vmatprep.mubr.msk.bf16.mxu1 %vm280_vm0, %v4075_v60  ;;  %3858 = vmatprep.subr.msk.bf16.mxu1 %vm1411_vm5, %v3347_v47  ;;  %v1413_v60 = vsel %vm1411_vm5, %v3347_v47, 0 }
  0xdd   : > { %3667 = vmatpush3.bf16.msra.mxu1 %v1413_v60 }
  0xde   : > { %3860 = vmatprep.subr.msk.bf16.mxu1 %vm1411_vm5, %v4233_v0 }
  0xe2   : > { %3659 = vmatmul.mubr.msk.bf16.vlgmr.msra.gmra.mxu0 %vm280_vm0, %v4121_v37 }
  0xe3   : > { %3653 = vmatmul.mubr.msk.bf16.gmra.mxu1 %vm280_vm0, %v1147_v5  ;;  %3662 = vmatprep.mubr.msk.bf16.mxu0 %vm280_vm0, %v636_v42 }
  0xe4   : > { %3677 = vmatpush3.bf16.msra.mxu0 %v1493_v9 }
  0xe5   : > { %3861 = vmatprep.subr.msk.bf16.mxu0 %vm1411_vm5, %v4240_v10 }
  0xea   : > { %3663 = vmatmul.mubr.msk.bf16.gmra.mxu0 %vm280_vm0, %v1249_v7 }
 0x15e   : > { %v4244_v11 = vpop.f32.mrf.mxu1 }
 0x160   : > { %v4246_v12 = vpop.f32.mrf.mxu1 }
 0x162   : > { %v4248_v13 = vpop.f32.mrf.mxu1 }
 0x164   : > { %v4250_v14 = vpop.f32.mrf.mxu1 }
 0x16a   : > { %v3580_v15 = vpop.f32.mrf.mxu0 }
 0x16b   : > { %v3590_v17 = vpop.f32.mrf.mxu1 }
 0x16c   : > { %v514_v18 = vpop.f32.mrf.mxu0  ;;  %v603_v62 = vadd.f32 %v3590_v17, %v3580_v15 }
 0x16d   : > { %v594_v19 = vpop.f32.mrf.mxu1 }
 0x16e   : > { %v3581_v20 = vpop.f32.mrf.mxu0  ;;  %v595_v2 = vadd.f32 %v594_v19, %v514_v18 }
 0x16f   : > { %v3591_v21 = vpop.f32.mrf.mxu1 }
 0x170   : > { %v517_v22 = vpop.f32.mrf.mxu0  ;;  %v606_v5 = vadd.f32 %v3591_v21, %v3581_v20 }
 0x171   : > { %v597_v23 = vpop.f32.mrf.mxu1 }
 0x172   : > { %v3600_v25 = vpop.f32.mrf.mxu0  ;;  %v598_v8 = vadd.f32 %v597_v23, %v517_v22 }
 0x173   : > { %v3594_v24 = vpop.f32.mrf.mxu1  ;;  %v721_v57 = vadd.f32 %v3600_v25, %v603_v62 }
 0x174   : > { %v688_v27 = vpop.f32.mrf.mxu0 }
 0x175   : > { %v610_v26 = vpop.f32.mrf.mxu1  ;;  %v719_v6 = vadd.f32 %v688_v27, %v595_v2 }
 0x176   : > { %v3601_v28 = vpop.f32.mrf.mxu0  ;;  %v611_v25 = vadd.f32 %v610_v26, %v4246_v12 }
 0x177   : > { %v4252_v16 = vpop.f32.mrf.mxu1  ;;  %v722_v9 = vadd.f32 %v3601_v28, %v606_v5 }
 0x178   : > { %v691_v30 = vpop.f32.mrf.mxu0  ;;  %v622_v23 = vadd.f32 %v4252_v16, %v4248_v13  ;;  %v4286_v13 = vld [vmem:[%s4654_s2] ss:$0 sm:$0xff] }
 0x179   : > { %v4254_v29 = vpop.f32.mrf.mxu1 }
 0x17a   : > { %v3604_v31 = vpop.f32.mrf.mxu0  ;;  %v614_v12 = vadd.f32 %v4254_v29, %v4250_v14 }
 0x17b   : > { %v3610_v32 = vpop.f32.mrf.mxu1 }
 0x17c   : > { %v704_v33 = vpop.f32.mrf.mxu0  ;;  %v823_v7 = vadd.f32 %v3610_v32, %v721_v57 }
 0x17d   : > { %v790_v34 = vpop.f32.mrf.mxu1  ;;  %v723_v28 = vadd.f32 %v704_v33, %v611_v25 }
 0x17e   : > { %v4256_v35 = vpop.f32.mrf.mxu0  ;;  %v821_v10 = vadd.f32 %v790_v34, %v719_v6 }
 0x17f   : > { %v3611_v36 = vpop.f32.mrf.mxu1  ;;  %v726_v26 = vadd.f32 %v4256_v35, %v622_v23 }
 0x180   : > { %v4258_v37 = vpop.f32.mrf.mxu0 }
 0x181   : > { %v793_v38 = vpop.f32.mrf.mxu1 }
 0x182   : > { %v3620_v40 = vpop.f32.mrf.mxu0 }
 0x183   : > { %v3614_v39 = vpop.f32.mrf.mxu1  ;;  %v925_v0 = vadd.f32 %v3620_v40, %v823_v7 }
 0x184   : > { %v892_v42 = vpop.f32.mrf.mxu0 }
 0x185   : > { %v806_v41 = vpop.f32.mrf.mxu1  ;;  %v923_v18 = vadd.f32 %v892_v42, %v821_v10 }
 0x186   : > { %v3621_v46 = vpop.f32.mrf.mxu0 }
 0x187   : > { %v4260_v45 = vpop.f32.mrf.mxu1 }
 0x188   : > { %v895_v49 = vpop.f32.mrf.mxu0 }
 0x189   : > { %v4262_v48 = vpop.f32.mrf.mxu1 }
 0x18a   : > { %v3624_v50 = vpop.f32.mrf.mxu0 }
 0x18b   : > { %v3630_v51 = vpop.f32.mrf.mxu1 }
 0x18c   : > { %v4264_v52 = vpop.f32.mrf.mxu0  ;;  %v1027_v19 = vadd.f32 %v3630_v51, %v925_v0  ;;  %v828_v51 = vadd.f32 %v4260_v45, %v726_v26 }
 0x18d   : > { %v994_v53 = vpop.f32.mrf.mxu1 }
 0x18e   : > { %v4266_v54 = vpop.f32.mrf.mxu0  ;;  %v1025_v2 = vadd.f32 %v994_v53, %v923_v18 }
 0x18f   : > { %v3631_v55 = vpop.f32.mrf.mxu1 }
 0x190   : > { %v4268_v58 = vpop.f32.mrf.mxu0 }
 0x191   : > { %4673 = vst [vmem:[#allocation6_spill] sm:$0xff] %v4268_v58  ;;  %v997_v59 = vpop.f32.mrf.mxu1  ;;  %v619_v58 = vadd.f32 %v3594_v24, %v4244_v11 }
 0x192   : > { %v3640_v44 = vpop.f32.mrf.mxu0 }
 0x193   : > { %v3634_v43 = vpop.f32.mrf.mxu1  ;;  %v725_v62 = vadd.f32 %v3604_v31, %v619_v58  ;;  %v1130_v22 = vadd.f32 %v3640_v44, %v1027_v19  ;;  %v825_v31 = vadd.f32 %v806_v41, %v723_v28 }
 0x194   : > { %v1097_v61 = vpop.f32.mrf.mxu0 }
 0x195   : > { %v4270_v56 = vpop.f32.mrf.mxu1  ;;  %v827_v11 = vadd.f32 %v3614_v39, %v725_v62  ;;  %v1128_v10 = vadd.f32 %v1097_v61, %v1025_v2  ;;  %v927_v14 = vadd.f32 %v4264_v52, %v825_v31 }
 0x196   : > { %4674 = vst [vmem:[#allocation7_spill] sm:$0xff] %v4270_v56  ;;  %v3641_v1 = vpop.f32.mrf.mxu0  ;;  %v824_v56 = vadd.f32 %v3611_v36, %v722_v9 }
 0x197   : > { %v4272_v63 = vpop.f32.mrf.mxu1 }
 0x198   : > { %4675 = vst [vmem:[#allocation8_spill] sm:$0xff] %v4272_v63  ;;  %v1100_v4 = vpop.f32.mrf.mxu0  ;;  %v720_v63 = vadd.f32 %v691_v30, %v598_v8  ;;  %v926_v32 = vadd.f32 %v3621_v46, %v824_v56  ;;  %v4677_v57 = vld [vmem:[#allocation6_spill] sm:$0xff] }
 0x199   : > { %v4274_v3 = vpop.f32.mrf.mxu1 }
 0x19a   : > { %v3644_v47 = vpop.f32.mrf.mxu0  ;;  %v822_v27 = vadd.f32 %v793_v38, %v720_v63  ;;  %v1028_v36 = vadd.f32 %v3631_v55, %v926_v32  ;;  %v929_v38 = vadd.f32 %v3624_v50, %v827_v11 }
 0x19b   : > { %v3650_v60 = vpop.f32.mrf.mxu1 }
 0x19c   : > { %v1113_v15 = vpop.f32.mrf.mxu0  ;;  %v924_v30 = vadd.f32 %v895_v49, %v822_v27  ;;  %v1232_v0 = vadd.f32 %v3650_v60, %v1130_v22  ;;  %v1131_v33 = vadd.f32 %v3641_v1, %v1028_v36  ;;  %v724_v49 = vadd.f32 %v4258_v37, %v614_v12 }
 0x19d   : > { %v1199_v17 = vpop.f32.mrf.mxu1  ;;  %v1031_v29 = vadd.f32 %v3634_v43, %v929_v38  ;;  %v4676_v56 = vld [vmem:[#allocation7_spill] sm:$0xff] }
 0x19e   : > { %v3645_v20 = vpop.f32.mrf.mxu0  ;;  %v1026_v16 = vadd.f32 %v997_v59, %v924_v30  ;;  %v1230_v39 = vadd.f32 %v1199_v17, %v1128_v10  ;;  %v826_v44 = vadd.f32 %v4262_v48, %v724_v49  ;;  %v930_v59 = vadd.f32 %v4266_v54, %v828_v51 }
 0x19f   : > { %v3651_v21 = vpop.f32.mrf.mxu1  ;;  %v1029_v61 = vadd.f32 %v4676_v56, %v927_v14  ;;  %v1134_v63 = vadd.f32 %v3644_v47, %v1031_v29 }
 0x1a0   : > { %v1116_v24 = vpop.f32.mrf.mxu0  ;;  %v1129_v50 = vadd.f32 %v1100_v4, %v1026_v16  ;;  %v1233_v53 = vadd.f32 %v3651_v21, %v1131_v33  ;;  %v928_v5 = vadd.f32 %v4677_v57, %v826_v44  ;;  %v4678_v4 = vld [vmem:[#allocation8_spill] sm:$0xff]  ;;  %v3371_v44 = vld [vmem:[%s4655_s3 + $0x14] sm:$0xf] }
 0x1a1   : > { %v1202_v34 = vpop.f32.mrf.mxu1  ;;  %v1032_v6 = vadd.f32 %v4678_v4, %v930_v59  ;;  %v1132_v7 = vadd.f32 %v1113_v15, %v1029_v61 }
 0x1a2   : > { %v3660_v42 = vpop.f32.mrf.mxu0  ;;  %v1231_v1 = vadd.f32 %v1202_v34, %v1129_v50  ;;  %v1030_v17 = vadd.f32 %v4274_v3, %v928_v5 }
 0x1a3   : > { %v3654_v40 = vpop.f32.mrf.mxu1  ;;  %v1334_v46 = vadd.f32 %v3660_v42, %v1232_v0  ;;  %v1135_v18 = vadd.f32 %v3645_v20, %v1032_v6  ;;  %v4307_v0 = vld [vmem:[#allocation3 + $0x1] sm:$0xff] }
 0x1a4   : > { %v1301_v41 = vpop.f32.mrf.mxu0  ;;  %v1236_v9 = vadd.f32 %v3654_v40, %v1134_v63  ;;  %v1133_v27 = vadd.f32 %v1116_v24, %v1030_v17  ;;  %4679 = vst [vmem:[#allocation7_spill] sm:$0xff] %v4307_v0  ;;  %v4309_v24 = vld [vmem:[#allocation3] sm:$0xff] }
 0x1a5   : > { %v1215_v35 = vpop.f32.mrf.mxu1  ;;  %v1349_v55 = vadd.f32 %v4286_v13, %v1334_v46  ;;  %v1332_v58 = vadd.f32 %v1301_v41, %v1230_v39  ;;  %4680 = vst [vmem:[#allocation6_spill] sm:$0xff] %v4309_v24  ;;  %v4681_v41 = vld [vmem:[#allocation4_spill] sm:$0xff] }
 0x1a6   : > { %v3661_v37 = vpop.f32.mrf.mxu0  ;;  %v1234_v25 = vadd.f32 %v1215_v35, %v1132_v7  ;;  %v1587_v50 = vsel %vm1411_vm5, %v4681_v41, 0 }
 0x1a7   : > { %v1357_v45 = vmax.f32 %v1349_v55, 0.0  ;;  %v1347_v52 = vadd.f32 %v4286_v13, %v1332_v58  ;;  %v1335_v43 = vadd.f32 %v3661_v37, %v1233_v53  ;;  %v3655_v60 = vpop.f32.mrf.mxu1  ;;  %v4682_v53 = vld [vmem:[#allocation5_spill] sm:$0xff]  ;;  %v3366_v58 = vld [vmem:[%s4655_s3 + $0x10] sm:$0xf] }
 0x1a8   : > { %v1304_v8 = vpop.f32.mrf.mxu0  ;;  %v1237_v22 = vadd.f32 %v3655_v60, %v1135_v18  ;;  %v1689_v55 = vsel %vm1411_vm5, %v4682_v53, 0  ;;  %v1791_v18 = vsel %vm1411_vm5, %v3366_v58, 0  ;;  %v4464_v53 = vld [vmem:[%s4657_s5 + $0xc] sm:$0xf] }
 0x1a9   : > { %1366 = vst.msk [vmem:[#allocation3 + $0x31] sm:$0xff] %vm302_vm3, %v1357_v45  ;;  %v1355_v48 = vmax.f32 %v1347_v52, 0.0  ;;  %v1350_v54 = vadd.f32 %v4286_v13, %v1335_v43  ;;  %v1333_v47 = vadd.f32 %v1304_v8, %v1231_v1  ;;  %v1218_v32 = vpop.f32.mrf.mxu1  ;;  %v4366_v52 = vld [vmem:[#allocation3 + $0x2] sm:$0xff]  ;;  %4688 = vst [vmem:[#allocation11_spill] sm:$0xff] %v4464_v53 }
 0x1aa   : > { %v3664_v19 = vpop.f32.mrf.mxu0  ;;  %v1235_v20 = vadd.f32 %v1218_v32, %v1133_v27  ;;  %4683 = vst [vmem:[#allocation8_spill] sm:$0xff] %v4366_v52  ;;  %v3381_v27 = vld [vmem:[%s4655_s3 + $0x1c] sm:$0xf] }
 0x1ab   : > { %1364 = vst.msk [vmem:[#allocation3 + $0x11] sm:$0xff] %vm302_vm3, %v1355_v48  ;;  %v1358_v62 = vmax.f32 %v1350_v54, 0.0  ;;  %v1348_v21 = vadd.f32 %v4286_v13, %v1333_v47  ;;  %v1338_v15 = vadd.f32 %v3664_v19, %v1236_v9 }
 0x1ac   : > { %v1317_v2 = vpop.f32.mrf.mxu0 }
 0x1ad   : > { %1367 = vst.msk [vmem:[#allocation3 + $0x41] sm:$0xff] %vm302_vm3, %v1358_v62  ;;  %v1356_v23 = vmax.f32 %v1348_v21, 0.0  ;;  %v1353_v28 = vadd.f32 %v4286_v13, %v1338_v15  ;;  %v1336_v11 = vadd.f32 %v1317_v2, %v1234_v25  ;;  %v1893_v62 = vsel %vm1411_vm5, %v3371_v44, 0  ;;  %v3376_v15 = vld [vmem:[%s4655_s3 + $0x18] sm:$0xf] }
 0x1ae   : > { %v3665_v3 = vpop.f32.mrf.mxu0 }
 0x1af   : > { %1365 = vst.msk [vmem:[#allocation3 + $0x21] sm:$0xff] %vm302_vm3, %v1356_v23  ;;  %v1361_v34 = vmax.f32 %v1353_v28, 0.0  ;;  %v1351_v30 = vadd.f32 %v4286_v13, %v1336_v11  ;;  %v1339_v36 = vadd.f32 %v3665_v3, %v1237_v22 }
 0x1b0   : > { %v1320_v10 = vpop.f32.mrf.mxu0  ;;  %v4323_v49 = vld [vmem:[#allocation3 + $0x31] sm:$0xff] }
 0x1b1   : > { %1370 = vst.msk [vmem:[#allocation3 + $0x71] sm:$0xff] %vm302_vm3, %v1361_v34  ;;  %v1359_v12 = vmax.f32 %v1351_v30, 0.0  ;;  %v1354_v26 = vadd.f32 %v4286_v13, %v1339_v36  ;;  %v1337_v31 = vadd.f32 %v1320_v10, %v1235_v20  ;;  %v1375_v29 = vld [vmem:[#allocation3 + $0x30] sm:$0xff]  ;;  %v1996_v30 = vsel %vm1411_vm5, %v3376_v15, 0 }
 0x1b2   : > { %v4313_v38 = vld [vmem:[#allocation3 + $0x11] sm:$0xff]  ;;  %v2098_v10 = vsel %vm1411_vm5, %v3381_v27, 0 }
 0x1b3   : > { %v1373_v40 = vld [vmem:[#allocation3 + $0x10] sm:$0xff]  ;;  %1368 = vst.msk [vmem:[#allocation3 + $0x51] sm:$0xff] %vm302_vm3, %v1359_v12  ;;  %v1362_v42 = vmax.f32 %v1354_v26, 0.0  ;;  %v1352_v16 = vadd.f32 %v4286_v13, %v1337_v31  ;;  %v1393_v33 = vpack.c.bf16 %v4313_v38, %v4307_v0  ;;  %v3386_v26 = vld [vmem:[%s4655_s3 + $0x20] sm:$0xf] }
 0x1b4   : > { %v1380_v39 = vpack.c.bf16 %v1373_v40, %v4309_v24  ;;  %v4348_v59 = vld [vmem:[#allocation3 + $0x41] sm:$0xff]  ;;  %v1561_v43 = vld [vmem:[#allocation3 + $0x12] sm:$0xff] }
 0x1b5   : > { %1371 = vst.msk [vmem:[#allocation3 + $0x81] sm:$0xff] %vm302_vm3, %v1362_v42  ;;  %v1360_v46 = vmax.f32 %v1352_v16, 0.0  ;;  %3668 = vmatprep.mubr.msk.bf16.mxu1 %vm302_vm3, %v1393_v33  ;;  %v1376_v61 = vld [vmem:[#allocation3 + $0x40] sm:$0xff]  ;;  %v1568_v60 = vpack.c.bf16 %v1561_v43, %v4366_v52  ;;  %v1563_v54 = vld [vmem:[#allocation3 + $0x32] sm:$0xff]  ;;  %v1773_v20 = vpack.c.bf16 %v4348_v59, %v4323_v49  ;;  %v2200_v16 = vsel %vm1411_vm5, %v3386_v26, 0 }
 0x1b6   : > { %3678 = vmatprep.mubr.msk.bf16.mxu0 %vm302_vm3, %v1380_v39  ;;  %v4325_v51 = vld [vmem:[#allocation3 + $0x21] sm:$0xff]  ;;  %v1671_v17 = vpack.c.bf16 %v1376_v61, %v1375_v29  ;;  %v4429_v33 = vld [vmem:[#allocation3 + $0x90] sm:$0xff] }
 0x1b7   : > { %v1374_v14 = vld [vmem:[#allocation3 + $0x20] sm:$0xff]  ;;  %1369 = vst.msk [vmem:[#allocation3 + $0x61] sm:$0xff] %vm302_vm3, %v1360_v46  ;;  %v4330_v13 = vpack.c.bf16 %v4323_v49, %v4325_v51  ;;  %v1772_v11 = vpack.c.bf16 %v4325_v51, %v4313_v38  ;;  %4684 = vst [vmem:[#allocation4_spill] sm:$0xff] %v4429_v33  ;;  %v4431_v39 = vld [vmem:[#allocation3 + $0x91] sm:$0xff] }
 0x1b8   : > { %v4332_v35 = vpack.c.bf16 %v1375_v29, %v1374_v14  ;;  %v4364_v45 = vld [vmem:[#allocation3 + $0x71] sm:$0xff]  ;;  %v1670_v8 = vpack.c.bf16 %v1374_v14, %v1373_v40  ;;  %v1562_v9 = vld [vmem:[#allocation3 + $0x22] sm:$0xff]  ;;  %4685 = vst [vmem:[#allocation5_spill] sm:$0xff] %v4431_v39 }
 0x1b9   : > { %3669 = vmatmul.mubr.msk.bf16.vlgmr.msra.gmra.mxu1 %vm302_vm3, %v4330_v13  ;;  %v1379_v4 = vld [vmem:[#allocation3 + $0x70] sm:$0xff]  ;;  %v1569_v47 = vpack.c.bf16 %v1563_v54, %v1562_v9  ;;  %v1564_v19 = vld [vmem:[#allocation3 + $0x42] sm:$0xff]  ;;  %v1874_v3 = vpack.c.bf16 %v1562_v9, %v1561_v43 }
 0x1ba   : > { %3679 = vmatmul.mubr.msk.bf16.vlgmr.msra.gmra.mxu0 %vm302_vm3, %v4332_v35  ;;  %3687 = vmatpush3.bf16.msra.mxu1 %v1587_v50  ;;  %v4350_v56 = vld [vmem:[#allocation3 + $0x51] sm:$0xff]  ;;  %v1875_v34 = vpack.c.bf16 %v1564_v19, %v1563_v54  ;;  %v3392_v29 = vld [vmem:[%s4657_s5 + $0x4] sm:$0xf]  ;;  %v4457_v50 = vld [vmem:[%s4657_s5 + $0x8] sm:$0xf] }
 0x1bb   : > { %v1377_v63 = vld [vmem:[#allocation3 + $0x50] sm:$0xff]  ;;  %3697 = vmatpush3.bf16.msra.mxu0 %v1689_v55  ;;  %v4354_v37 = vpack.c.bf16 %v4350_v56, %v4348_v59  ;;  %3862 = vmatprep.subr.msk.bf16.mxu1 %vm1411_vm5, %v3366_v58  ;;  %4687 = vst [vmem:[#allocation10_spill] sm:$0xff] %v4457_v50 }
 0x1bc   : > { %v4356_v1 = vpack.c.bf16 %v1377_v63, %v1376_v61  ;;  %3863 = vmatprep.subr.msk.bf16.mxu0 %vm1411_vm5, %v3371_v44  ;;  %v1565_v48 = vld [vmem:[#allocation3 + $0x52] sm:$0xff]  ;;  %v1669_v2 = vld [vmem:[#allocation3 + $0x80] sm:$0xff] }
 0x1bd   : > { %3672 = vmatprep.mubr.msk.bf16.mxu1 %vm302_vm3, %v4354_v37  ;;  %v1570_v25 = vpack.c.bf16 %v1565_v48, %v1564_v19  ;;  %v1567_v22 = vld [vmem:[#allocation3 + $0x72] sm:$0xff]  ;;  %v1673_v28 = vpack.c.bf16 %v1669_v2, %v1379_v4  ;;  %v1771_v31 = vld [vmem:[#allocation3 + $0x81] sm:$0xff]  ;;  %v1980_v46 = vpack.c.bf16 %v4429_v33, %v1669_v2 }
 0x1be   : > { %3682 = vmatprep.mubr.msk.bf16.mxu0 %vm302_vm3, %v4356_v1  ;;  %v1391_v57 = vld [vmem:[#allocation3 + $0x61] sm:$0xff]  ;;  %v1775_v40 = vpack.c.bf16 %v1771_v31, %v4364_v45  ;;  %v2082_v49 = vpack.c.bf16 %v4431_v39, %v1771_v31  ;;  %v4440_v51 = vld [vmem:[#allocation3 + $0x92] sm:$0xff] }
 0x1bf   : > { %v1378_v5 = vld [vmem:[#allocation3 + $0x60] sm:$0xff]  ;;  %v4369_v6 = vpack.c.bf16 %v4364_v45, %v1391_v57  ;;  %v1774_v36 = vpack.c.bf16 %v1391_v57, %v4350_v56  ;;  %4686 = vst [vmem:[#allocation9_spill] sm:$0xff] %v4440_v51 }
 0x1c0   : > { %v4371_v7 = vpack.c.bf16 %v1379_v4, %v1378_v5  ;;  %v1672_v21 = vpack.c.bf16 %v1378_v5, %v1377_v63  ;;  %v1566_v32 = vld [vmem:[#allocation3 + $0x62] sm:$0xff] }
 0x1c1   : > { %3673 = vmatmul.mubr.msk.bf16.gmra.mxu1 %vm302_vm3, %v4369_v6  ;;  %v1571_v23 = vpack.c.bf16 %v1567_v22, %v1566_v32  ;;  %v1876_v12 = vpack.c.bf16 %v1566_v32, %v1565_v48  ;;  %v1873_v38 = vld [vmem:[#allocation3 + $0x82] sm:$0xff] }
 0x1c2   : > { %3683 = vmatmul.mubr.msk.bf16.gmra.mxu0 %vm302_vm3, %v4371_v7  ;;  %3688 = vmatprep.mubr.msk.bf16.mxu1 %vm302_vm3, %v1568_v60  ;;  %v1877_v42 = vpack.c.bf16 %v1873_v38, %v1567_v22  ;;  %v2184_v14 = vpack.c.bf16 %v4440_v51, %v1873_v38 }
 0x1c3   : > { %3698 = vmatprep.mubr.msk.bf16.mxu0 %vm302_vm3, %v1670_v8 }
 0x1c9   : > { %3689 = vmatmul.mubr.msk.bf16.vlgmr.msra.gmra.mxu1 %vm302_vm3, %v1569_v47 }
 0x1ca   : > { %3699 = vmatmul.mubr.msk.bf16.vlgmr.msra.gmra.mxu0 %vm302_vm3, %v1671_v17  ;;  %3707 = vmatpush3.bf16.msra.mxu1 %v1791_v18 }
 0x1cb   : > { %3692 = vmatprep.mubr.msk.bf16.mxu1 %vm302_vm3, %v1570_v25  ;;  %3702 = vmatprep.mubr.msk.bf16.mxu0 %vm302_vm3, %v1672_v21 }
 0x1cc   : > { %3717 = vmatpush3.bf16.msra.mxu0 %v1893_v62  ;;  %3864 = vmatprep.subr.msk.bf16.mxu1 %vm1411_vm5, %v3376_v15 }
 0x1cd   : > { %3865 = vmatprep.subr.msk.bf16.mxu0 %vm1411_vm5, %v3381_v27 }
 0x1d1   : > { %3693 = vmatmul.mubr.msk.bf16.gmra.mxu1 %vm302_vm3, %v1571_v23 }
 0x1d2   : > { %3703 = vmatmul.mubr.msk.bf16.gmra.mxu0 %vm302_vm3, %v1673_v28  ;;  %3708 = vmatprep.mubr.msk.bf16.mxu1 %vm302_vm3, %v1772_v11 }
 0x1d3   : > { %3718 = vmatprep.mubr.msk.bf16.mxu0 %vm302_vm3, %v1874_v3 }
 0x1d9   : > { %3709 = vmatmul.mubr.msk.bf16.vlgmr.msra.gmra.mxu1 %vm302_vm3, %v1773_v20 }
 0x1da   : > { %3719 = vmatmul.mubr.msk.bf16.vlgmr.msra.gmra.mxu0 %vm302_vm3, %v1875_v34  ;;  %3727 = vmatpush3.bf16.msra.mxu1 %v1996_v30 }
 0x1db   : > { %3712 = vmatprep.mubr.msk.bf16.mxu1 %vm302_vm3, %v1774_v36  ;;  %3722 = vmatprep.mubr.msk.bf16.mxu0 %vm302_vm3, %v1876_v12 }
 0x1dc   : > { %3737 = vmatpush3.bf16.msra.mxu0 %v2098_v10  ;;  %3866 = vmatprep.subr.msk.bf16.mxu1 %vm1411_vm5, %v3386_v26 }
 0x1dd   : > { %3867 = vmatprep.subr.msk.bf16.mxu0 %vm1411_vm5, %v3392_v29 }
 0x1e1   : > { %3713 = vmatmul.mubr.msk.bf16.gmra.mxu1 %vm302_vm3, %v1775_v40 }
 0x1e2   : > { %3723 = vmatmul.mubr.msk.bf16.gmra.mxu0 %vm302_vm3, %v1877_v42  ;;  %3728 = vmatprep.mubr.msk.bf16.mxu1 %vm302_vm3, %v4332_v35  ;;  %v2318_v35 = vld [vmem:[%s4657_s5] sm:$0xf] }
 0x1e3   : > { %3738 = vmatprep.mubr.msk.bf16.mxu0 %vm302_vm3, %v4330_v13  ;;  %v2346_v13 = vsel %vm1411_vm5, %v3392_v29, 0  ;;  %v2426_v41 = vsel %vm1411_vm5, %v2318_v35, 0 }
 0x1e9   : > { %3729 = vmatmul.mubr.msk.bf16.vlgmr.msra.gmra.mxu1 %vm302_vm3, %v4356_v1 }
 0x1ea   : > { %3739 = vmatmul.mubr.msk.bf16.vlgmr.msra.gmra.mxu0 %vm302_vm3, %v4354_v37  ;;  %3747 = vmatpush3.bf16.msra.mxu1 %v2200_v16 }
 0x1eb   : > { %3732 = vmatprep.mubr.msk.bf16.mxu1 %vm302_vm3, %v4371_v7  ;;  %3742 = vmatprep.mubr.msk.bf16.mxu0 %vm302_vm3, %v4369_v6 }
 0x1ec   : > { %3757 = vmatpush3.bf16.msra.mxu0 %v2346_v13  ;;  %3868 = vmatprep.subr.msk.bf16.mxu1 %vm1411_vm5, %v2318_v35 }
 0x1ed   : > { %3869 = vmatprep.subr.msk.bf16.mxu0 %vm1411_vm5, %v4457_v50 }
 0x1f1   : > { %3733 = vmatmul.mubr.msk.bf16.gmra.mxu1 %vm302_vm3, %v1980_v46 }
 0x1f2   : > { %3743 = vmatmul.mubr.msk.bf16.gmra.mxu0 %vm302_vm3, %v2082_v49  ;;  %3748 = vmatprep.mubr.msk.bf16.mxu1 %vm302_vm3, %v1569_v47 }
 0x1f9   : > { %3749 = vmatmul.mubr.msk.bf16.vlgmr.msra.gmra.mxu1 %vm302_vm3, %v1570_v25 }
 0x1fa   : > { %3752 = vmatprep.mubr.msk.bf16.mxu1 %vm302_vm3, %v1571_v23  ;;  %3767 = vmatpush3.bf16.msra.mxu1 %v2426_v41 }
 0x1fb   : > { %3870 = vmatprep.subr.msk.bf16.mxu1 %vm1411_vm5, %v4464_v53 }
 0x201   : > { %3753 = vmatmul.mubr.msk.bf16.gmra.mxu1 %vm302_vm3, %v2184_v14 }
 0x279   : > { %v3670_v55 = vpop.f32.mrf.mxu1 }
 0x27a   : > { %v3680_v58 = vpop.f32.mrf.mxu0 }
 0x27b   : > { %v1449_v44 = vpop.f32.mrf.mxu1  ;;  %v1538_v40 = vadd.f32 %v3680_v58, %v3670_v55 }
 0x27c   : > { %v1529_v59 = vpop.f32.mrf.mxu0 }
 0x27d   : > { %v3671_v56 = vpop.f32.mrf.mxu1  ;;  %v1530_v46 = vadd.f32 %v1529_v59, %v1449_v44 }
 0x27e   : > { %v3681_v61 = vpop.f32.mrf.mxu0 }
 0x27f   : > { %v1452_v63 = vpop.f32.mrf.mxu1  ;;  %v1541_v13 = vadd.f32 %v3681_v61, %v3671_v56 }
 0x280   : > { %v1532_v37 = vpop.f32.mrf.mxu0 }
 0x281   : > { %v3674_v1 = vpop.f32.mrf.mxu1  ;;  %v1533_v51 = vadd.f32 %v1532_v37, %v1452_v63 }
 0x282   : > { %v3684_v45 = vpop.f32.mrf.mxu0 }
 0x283   : > { %v1465_v43 = vpop.f32.mrf.mxu1  ;;  %v1554_v52 = vadd.f32 %v3684_v45, %v3674_v1 }
 0x284   : > { %v1545_v57 = vpop.f32.mrf.mxu0 }
 0x285   : > { %v3675_v5 = vpop.f32.mrf.mxu1  ;;  %v1546_v55 = vadd.f32 %v1545_v57, %v1465_v43 }
 0x286   : > { %v3685_v4 = vpop.f32.mrf.mxu0 }
 0x287   : > { %v4468_v6 = vpop.f32.mrf.mxu1  ;;  %v1557_v59 = vadd.f32 %v3685_v4, %v3675_v5 }
 0x288   : > { %v1548_v7 = vpop.f32.mrf.mxu0 }
 0x289   : > { %v3690_v60 = vpop.f32.mrf.mxu1  ;;  %v1549_v37 = vadd.f32 %v1548_v7, %v4468_v6 }
 0x28a   : > { %v3700_v8 = vpop.f32.mrf.mxu0  ;;  %v1656_v49 = vadd.f32 %v3690_v60, %v1538_v40 }
 0x28b   : > { %v1623_v9 = vpop.f32.mrf.mxu1 }
 0x28c   : > { %v1725_v48 = vpop.f32.mrf.mxu0  ;;  %v1654_v35 = vadd.f32 %v1623_v9, %v1530_v46  ;;  %v1758_v39 = vadd.f32 %v3700_v8, %v1656_v49 }
 0x28d   : > { %v3691_v54 = vpop.f32.mrf.mxu1 }
 0x28e   : > { %v3701_v47 = vpop.f32.mrf.mxu0  ;;  %v1657_v33 = vadd.f32 %v3691_v54, %v1541_v13  ;;  %v1756_v24 = vadd.f32 %v1725_v48, %v1654_v35 }
 0x28f   : > { %v1626_v17 = vpop.f32.mrf.mxu1 }
 0x290   : > { %v1728_v18 = vpop.f32.mrf.mxu0  ;;  %v1655_v0 = vadd.f32 %v1626_v17, %v1533_v51 }
 0x291   : > { %v3694_v19 = vpop.f32.mrf.mxu1 }
 0x292   : > { %v3704_v25 = vpop.f32.mrf.mxu0  ;;  %v1660_v58 = vadd.f32 %v3694_v19, %v1554_v52  ;;  %v1757_v61 = vadd.f32 %v1728_v18, %v1655_v0 }
 0x293   : > { %v1639_v62 = vpop.f32.mrf.mxu1 }
 0x294   : > { %v1741_v21 = vpop.f32.mrf.mxu0  ;;  %v1658_v60 = vadd.f32 %v1639_v62, %v1546_v55  ;;  %v1762_v1 = vadd.f32 %v3704_v25, %v1660_v58 }
 0x295   : > { %v3695_v15 = vpop.f32.mrf.mxu1 }
 0x296   : > { %v3705_v27 = vpop.f32.mrf.mxu0  ;;  %v1661_v45 = vadd.f32 %v3695_v15, %v1557_v59  ;;  %v1760_v43 = vadd.f32 %v1741_v21, %v1658_v60  ;;  %v3391_v21 = vld [vmem:[%s4656_s4] ss:$0 sm:$0xff] }
 0x297   : > { %v1642_v32 = vpop.f32.mrf.mxu1 }
 0x298   : > { %v4470_v2 = vpop.f32.mrf.mxu0  ;;  %v1659_v52 = vadd.f32 %v1642_v32, %v1549_v37  ;;  %v1763_v54 = vadd.f32 %v3705_v27, %v1661_v45 }
 0x299   : > { %v3710_v22 = vpop.f32.mrf.mxu1 }
 0x29a   : > { %v3720_v23 = vpop.f32.mrf.mxu0  ;;  %v1761_v6 = vadd.f32 %v4470_v2, %v1659_v52 }
 0x29b   : > { %v1827_v28 = vpop.f32.mrf.mxu1 }
 0x29c   : > { %v1929_v11 = vpop.f32.mrf.mxu0  ;;  %v1858_v44 = vadd.f32 %v1827_v28, %v1756_v24 }
 0x29d   : > { %v3711_v3 = vpop.f32.mrf.mxu1 }
 0x29e   : > { %v3721_v20 = vpop.f32.mrf.mxu0  ;;  %v1960_v48 = vadd.f32 %v1929_v11, %v1858_v44 }
 0x29f   : > { %v1830_v34 = vpop.f32.mrf.mxu1 }
 0x2a0   : > { %v1932_v30 = vpop.f32.mrf.mxu0  ;;  %v1859_v51 = vadd.f32 %v1830_v34, %v1757_v61 }
 0x2a1   : > { %v3714_v36 = vpop.f32.mrf.mxu1 }
 0x2a2   : > { %v3724_v10 = vpop.f32.mrf.mxu0  ;;  %v1864_v57 = vadd.f32 %v3714_v36, %v1762_v1  ;;  %v1961_v17 = vadd.f32 %v1932_v30, %v1859_v51 }
 0x2a3   : > { %v1843_v12 = vpop.f32.mrf.mxu1 }
 0x2a4   : > { %v4472_v26 = vpop.f32.mrf.mxu0  ;;  %v1966_v7 = vadd.f32 %v3724_v10, %v1864_v57 }
 0x2a5   : > { %4689 = vst [vmem:[#allocation12_spill] sm:$0xff] %v4472_v26  ;;  %v3715_v31 = vpop.f32.mrf.mxu1 }
 0x2a6   : > { %v4474_v38 = vpop.f32.mrf.mxu0  ;;  %v1865_v25 = vadd.f32 %v3715_v31, %v1763_v54 }
 0x2a7   : > { %4690 = vst [vmem:[#allocation13_spill] sm:$0xff] %v4474_v38  ;;  %v1846_v42 = vpop.f32.mrf.mxu1  ;;  %v1860_v38 = vadd.f32 %v3710_v22, %v1758_v39 }
 0x2a8   : > { %v4476_v16 = vpop.f32.mrf.mxu0  ;;  %v1863_v11 = vadd.f32 %v1846_v42, %v1761_v6 }
 0x2a9   : > { %4691 = vst [vmem:[#allocation14_spill] sm:$0xff] %v4476_v16  ;;  %v3730_v14 = vpop.f32.mrf.mxu1  ;;  %v1759_v16 = vadd.f32 %v3701_v47, %v1657_v33  ;;  %v1962_v9 = vadd.f32 %v3720_v23, %v1860_v38  ;;  %v1862_v47 = vadd.f32 %v1843_v12, %v1760_v43 }
 0x2aa   : > { %v3740_v29 = vpop.f32.mrf.mxu0 }
 0x2ab   : > { %v2032_v41 = vpop.f32.mrf.mxu1  ;;  %v1861_v63 = vadd.f32 %v3711_v3, %v1759_v16  ;;  %v2065_v39 = vadd.f32 %v3730_v14, %v1962_v9 }
 0x2ac   : > { %v2134_v53 = vpop.f32.mrf.mxu0  ;;  %v2063_v4 = vadd.f32 %v2032_v41, %v1960_v48  ;;  %v4692_v28 = vld [vmem:[#allocation12_spill] sm:$0xff] }
 0x2ad   : > { %v3731_v50 = vpop.f32.mrf.mxu1  ;;  %v1963_v5 = vadd.f32 %v3721_v20, %v1861_v63  ;;  %v2167_v18 = vadd.f32 %v3740_v29, %v2065_v39  ;;  %v1964_v27 = vadd.f32 %v4692_v28, %v1862_v47  ;;  %v4698_v28 = vld [vmem:[#allocation11_spill] sm:$0xff] }
 0x2ae   : > { %v3741_v40 = vpop.f32.mrf.mxu0  ;;  %v2165_v32 = vadd.f32 %v2134_v53, %v2063_v4  ;;  %v4693_v2 = vld [vmem:[#allocation13_spill] sm:$0xff] }
 0x2af   : > { %v2035_v26 = vpop.f32.mrf.mxu1  ;;  %v2066_v19 = vadd.f32 %v3731_v50, %v1963_v5  ;;  %v1967_v36 = vadd.f32 %v4693_v2, %v1865_v25 }
 0x2b0   : > { %v2137_v33 = vpop.f32.mrf.mxu0  ;;  %v2064_v22 = vadd.f32 %v2035_v26, %v1961_v17  ;;  %v4694_v53 = vld [vmem:[#allocation14_spill] sm:$0xff] }
 0x2b1   : > { %v3734_v56 = vpop.f32.mrf.mxu1  ;;  %v2168_v34 = vadd.f32 %v3741_v40, %v2066_v19  ;;  %v1965_v26 = vadd.f32 %v4694_v53, %v1863_v11  ;;  %v3411_v11 = vld [vmem:[%s4657_s5 + $0x10] sm:$0xf]  ;;  %v4699_v53 = vld [vmem:[#allocation8_spill] sm:$0xff] }
 0x2b2   : > { %v3744_v62 = vpop.f32.mrf.mxu0  ;;  %v2069_v3 = vadd.f32 %v3734_v56, %v1966_v7  ;;  %v2166_v38 = vadd.f32 %v2137_v33, %v2064_v22  ;;  %v4697_v22 = vld [vmem:[#allocation10_spill] sm:$0xff] }
 0x2b3   : > { %v2048_v8 = vpop.f32.mrf.mxu1 }
 0x2b4   : > { %v2067_v10 = vadd.f32 %v2048_v8, %v1964_v27  ;;  %v2150_v12 = vpop.f32.mrf.mxu0  ;;  %v2171_v14 = vadd.f32 %v3744_v62, %v2069_v3  ;;  %v2622_v27 = vsel %vm1411_vm5, %v4698_v28, 0  ;;  %v3416_v3 = vld [vmem:[%s4657_s5 + $0x14] sm:$0xf] }
 0x2b5   : > { %v3735_v24 = vpop.f32.mrf.mxu1 }
 0x2b6   : > { %v2070_v13 = vadd.f32 %v3735_v24, %v1967_v36  ;;  %v2169_v55 = vadd.f32 %v2150_v12, %v2067_v10  ;;  %v3745_v58 = vpop.f32.mrf.mxu0 }
 0x2b7   : > { %v2051_v0 = vpop.f32.mrf.mxu1 }
 0x2b8   : > { %v2068_v59 = vadd.f32 %v2051_v0, %v1965_v26  ;;  %v2172_v9 = vadd.f32 %v3745_v58, %v2070_v13  ;;  %v2153_v45 = vpop.f32.mrf.mxu0  ;;  %v4695_v0 = vld [vmem:[#allocation7_spill] sm:$0xff] }
 0x2b9   : > { %v3750_v15 = vpop.f32.mrf.mxu1 }
 0x2ba   : > { %v2269_v23 = vadd.f32 %v3750_v15, %v2167_v18  ;;  %v2170_v48 = vadd.f32 %v2153_v45, %v2068_v59  ;;  %v4696_v18 = vld [vmem:[#allocation6_spill] sm:$0xff]  ;;  %v2826_v59 = vsel %vm1411_vm5, %v3416_v3, 0 }
 0x2bb   : > { %v2236_v20 = vpop.f32.mrf.mxu1 }
 0x2bc   : > { %v2284_v50 = vadd.f32 %v3391_v21, %v2269_v23  ;;  %v2267_v30 = vadd.f32 %v2236_v20, %v2165_v32  ;;  %v2520_v23 = vsel %vm1411_vm5, %v4697_v22, 0 }
 0x2bd   : > { %v3751_v31 = vpop.f32.mrf.mxu1 }
 0x2be   : > { %v2292_v16 = vmax.f32 %v2284_v50, 0.0  ;;  %v2282_v46 = vadd.f32 %v3391_v21, %v2267_v30  ;;  %v2270_v49 = vadd.f32 %v3751_v31, %v2168_v34 }
 0x2bf   : > { %v2239_v29 = vpop.f32.mrf.mxu1 }
 0x2c0   : > { %2300 = vst.msk [vmem:[#allocation3 + $0x31] sm:$0xff] %vm302_vm3, %v2292_v16  ;;  %v2290_v42 = vmax.f32 %v2282_v46, 0.0  ;;  %v2285_v35 = vadd.f32 %v3391_v21, %v2270_v49  ;;  %v2268_v41 = vadd.f32 %v2239_v29, %v2166_v38 }
 0x2c1   : > { %v3754_v44 = vpop.f32.mrf.mxu1 }
 0x2c2   : > { %2298 = vst.msk [vmem:[#allocation3 + $0x11] sm:$0xff] %vm302_vm3, %v2290_v42  ;;  %v2293_v60 = vmax.f32 %v2285_v35, 0.0  ;;  %v2283_v40 = vadd.f32 %v3391_v21, %v2268_v41  ;;  %v2273_v56 = vadd.f32 %v3754_v44, %v2171_v14 }
 0x2c3   : > { %v2252_v61 = vpop.f32.mrf.mxu1 }
 0x2c4   : > { %2301 = vst.msk [vmem:[#allocation3 + $0x41] sm:$0xff] %vm302_vm3, %v2293_v60  ;;  %v2291_v63 = vmax.f32 %v2283_v40, 0.0  ;;  %v2288_v37 = vadd.f32 %v3391_v21, %v2273_v56  ;;  %v2271_v1 = vadd.f32 %v2252_v61, %v2169_v55  ;;  %v2724_v55 = vsel %vm1411_vm5, %v3411_v11, 0  ;;  %v3421_v40 = vld [vmem:[%s4657_s5 + $0x18] sm:$0xf] }
 0x2c5   : > { %v3755_v8 = vpop.f32.mrf.mxu1  ;;  %v3426_v56 = vld [vmem:[%s4657_s5 + $0x1c] sm:$0xf] }
 0x2c6   : > { %2299 = vst.msk [vmem:[#allocation3 + $0x21] sm:$0xff] %vm302_vm3, %v2291_v63  ;;  %v2296_v51 = vmax.f32 %v2288_v37, 0.0  ;;  %v2286_v39 = vadd.f32 %v3391_v21, %v2271_v1  ;;  %v2274_v43 = vadd.f32 %v3755_v8, %v2172_v9 }
 0x2c7   : > { %v2255_v52 = vpop.f32.mrf.mxu1  ;;  %v4500_v7 = vld [vmem:[#allocation3 + $0x31] sm:$0xff] }
 0x2c8   : > { %2304 = vst.msk [vmem:[#allocation3 + $0x71] sm:$0xff] %vm302_vm3, %v2296_v51  ;;  %v2294_v57 = vmax.f32 %v2286_v39, 0.0  ;;  %v2289_v33 = vadd.f32 %v3391_v21, %v2274_v43  ;;  %v2272_v24 = vadd.f32 %v2255_v52, %v2170_v48  ;;  %v2309_v15 = vld [vmem:[#allocation3 + $0x30] sm:$0xff]  ;;  %v2928_v39 = vsel %vm1411_vm5, %v3421_v40, 0 }
 0x2c9   : > { %v4491_v5 = vld [vmem:[#allocation3 + $0x11] sm:$0xff]  ;;  %v3030_v52 = vsel %vm1411_vm5, %v3426_v56, 0 }
 0x2ca   : > { %v2307_v4 = vld [vmem:[#allocation3 + $0x10] sm:$0xff]  ;;  %2302 = vst.msk [vmem:[#allocation3 + $0x51] sm:$0xff] %vm302_vm3, %v2294_v57  ;;  %v2297_v54 = vmax.f32 %v2289_v33, 0.0  ;;  %v2287_v47 = vadd.f32 %v3391_v21, %v2272_v24  ;;  %v2327_v17 = vpack.c.bf16 %v4491_v5, %v4695_v0  ;;  %v3431_v33 = vld [vmem:[%s4657_s5 + $0x20] sm:$0xf] }
 0x2cb   : > { %v2314_v19 = vpack.c.bf16 %v2307_v4, %v4696_v18  ;;  %v2323_v20 = vld [vmem:[#allocation3 + $0x41] sm:$0xff]  ;;  %v2494_v12 = vld [vmem:[#allocation3 + $0x12] sm:$0xff] }
 0x2cc   : > { %2305 = vst.msk [vmem:[#allocation3 + $0x81] sm:$0xff] %vm302_vm3, %v2297_v54  ;;  %v2295_v6 = vmax.f32 %v2287_v47, 0.0  ;;  %3758 = vmatprep.mubr.msk.bf16.mxu0 %vm302_vm3, %v2327_v17  ;;  %v2310_v50 = vld [vmem:[#allocation3 + $0x40] sm:$0xff]  ;;  %v2501_v26 = vpack.c.bf16 %v2494_v12, %v4699_v53  ;;  %v2496_v42 = vld [vmem:[#allocation3 + $0x32] sm:$0xff]  ;;  %v2706_v48 = vpack.c.bf16 %v2323_v20, %v4500_v7  ;;  %v3132_v47 = vsel %vm1411_vm5, %v3431_v33, 0  ;;  %v4701_v18 = vld [vmem:[#allocation5_spill] sm:$0xff] }
 0x2cd   : > { %3768 = vmatprep.mubr.msk.bf16.mxu1 %vm302_vm3, %v2314_v19  ;;  %v4502_v25 = vld [vmem:[#allocation3 + $0x21] sm:$0xff]  ;;  %v2604_v41 = vpack.c.bf16 %v2310_v50, %v2309_v15 }
 0x2ce   : > { %v2308_v62 = vld [vmem:[#allocation3 + $0x20] sm:$0xff]  ;;  %2303 = vst.msk [vmem:[#allocation3 + $0x61] sm:$0xff] %vm302_vm3, %v2295_v6  ;;  %v4507_v21 = vpack.c.bf16 %v4500_v7, %v4502_v25  ;;  %v2705_v45 = vpack.c.bf16 %v4502_v25, %v4491_v5  ;;  %v4702_v6 = vld [vmem:[#allocation9_spill] sm:$0xff] }
 0x2cf   : > { %v4509_v32 = vpack.c.bf16 %v2309_v15, %v2308_v62  ;;  %v4538_v10 = vld [vmem:[#allocation3 + $0x71] sm:$0xff]  ;;  %v2603_v14 = vpack.c.bf16 %v2308_v62, %v2307_v4  ;;  %v2495_v29 = vld [vmem:[#allocation3 + $0x22] sm:$0xff] }
 0x2d0   : > { %3759 = vmatmul.mubr.msk.bf16.vlgmr.msra.gmra.mxu0 %vm302_vm3, %v4507_v21  ;;  %v2313_v16 = vld [vmem:[#allocation3 + $0x70] sm:$0xff]  ;;  %v2502_v35 = vpack.c.bf16 %v2496_v42, %v2495_v29  ;;  %v2497_v58 = vld [vmem:[#allocation3 + $0x42] sm:$0xff]  ;;  %v2807_v8 = vpack.c.bf16 %v2495_v29, %v2494_v12 }
 0x2d1   : > { %3769 = vmatmul.mubr.msk.bf16.vlgmr.msra.gmra.mxu1 %vm302_vm3, %v4509_v32  ;;  %3777 = vmatpush3.bf16.msra.mxu0 %v2520_v23  ;;  %v4525_v34 = vld [vmem:[#allocation3 + $0x51] sm:$0xff]  ;;  %v2808_v51 = vpack.c.bf16 %v2497_v58, %v2496_v42  ;;  %v4700_v0 = vld [vmem:[#allocation4_spill] sm:$0xff] }
 0x2d2   : > { %v2311_v30 = vld [vmem:[#allocation3 + $0x50] sm:$0xff]  ;;  %3787 = vmatpush3.bf16.msra.mxu1 %v2622_v27  ;;  %v4528_v2 = vpack.c.bf16 %v4525_v34, %v2323_v20  ;;  %3871 = vmatprep.subr.msk.bf16.mxu0 %vm1411_vm5, %v3411_v11 }
 0x2d3   : > { %v4530_v36 = vpack.c.bf16 %v2311_v30, %v2310_v50  ;;  %3872 = vmatprep.subr.msk.bf16.mxu1 %vm1411_vm5, %v3416_v3  ;;  %v2498_v13 = vld [vmem:[#allocation3 + $0x52] sm:$0xff]  ;;  %v2602_v9 = vld [vmem:[#allocation3 + $0x80] sm:$0xff] }
 0x2d4   : > { %3762 = vmatprep.mubr.msk.bf16.mxu0 %vm302_vm3, %v4528_v2  ;;  %v2503_v44 = vpack.c.bf16 %v2498_v13, %v2497_v58  ;;  %v2500_v63 = vld [vmem:[#allocation3 + $0x72] sm:$0xff]  ;;  %v2606_v1 = vpack.c.bf16 %v2602_v9, %v2313_v16  ;;  %v2704_v24 = vld [vmem:[#allocation3 + $0x81] sm:$0xff]  ;;  %v2912_v17 = vpack.c.bf16 %v4700_v0, %v2602_v9 }
 0x2d5   : > { %3772 = vmatprep.mubr.msk.bf16.mxu1 %vm302_vm3, %v4530_v36  ;;  %v2325_v31 = vld [vmem:[#allocation3 + $0x61] sm:$0xff]  ;;  %v2708_v4 = vpack.c.bf16 %v2704_v24, %v4538_v10  ;;  %v3014_v19 = vpack.c.bf16 %v4701_v18, %v2704_v24 }
 0x2d6   : > { %v2312_v38 = vld [vmem:[#allocation3 + $0x60] sm:$0xff]  ;;  %v4541_v46 = vpack.c.bf16 %v4538_v10, %v2325_v31  ;;  %v2707_v43 = vpack.c.bf16 %v2325_v31, %v4525_v34 }
 0x2d7   : > { %v4543_v49 = vpack.c.bf16 %v2313_v16, %v2312_v38  ;;  %v2605_v60 = vpack.c.bf16 %v2312_v38, %v2311_v30  ;;  %v2499_v61 = vld [vmem:[#allocation3 + $0x62] sm:$0xff] }
 0x2d8   : > { %3763 = vmatmul.mubr.msk.bf16.gmra.mxu0 %vm302_vm3, %v4541_v46  ;;  %v2504_v37 = vpack.c.bf16 %v2500_v63, %v2499_v61  ;;  %v2809_v57 = vpack.c.bf16 %v2499_v61, %v2498_v13  ;;  %v2806_v5 = vld [vmem:[#allocation3 + $0x82] sm:$0xff] }
 0x2d9   : > { %3773 = vmatmul.mubr.msk.bf16.gmra.mxu1 %vm302_vm3, %v4543_v49  ;;  %3778 = vmatprep.mubr.msk.bf16.mxu0 %vm302_vm3, %v2501_v26  ;;  %v2810_v54 = vpack.c.bf16 %v2806_v5, %v2500_v63  ;;  %v3116_v7 = vpack.c.bf16 %v4702_v6, %v2806_v5 }
 0x2da   : > { %3788 = vmatprep.mubr.msk.bf16.mxu1 %vm302_vm3, %v2603_v14 }
 0x2e0   : > { %3779 = vmatmul.mubr.msk.bf16.vlgmr.msra.gmra.mxu0 %vm302_vm3, %v2502_v35 }
 0x2e1   : > { %3789 = vmatmul.mubr.msk.bf16.vlgmr.msra.gmra.mxu1 %vm302_vm3, %v2604_v41  ;;  %3797 = vmatpush3.bf16.msra.mxu0 %v2724_v55 }
 0x2e2   : > { %3782 = vmatprep.mubr.msk.bf16.mxu0 %vm302_vm3, %v2503_v44  ;;  %3792 = vmatprep.mubr.msk.bf16.mxu1 %vm302_vm3, %v2605_v60 }
 0x2e3   : > { %3807 = vmatpush3.bf16.msra.mxu1 %v2826_v59  ;;  %3873 = vmatprep.subr.msk.bf16.mxu0 %vm1411_vm5, %v3421_v40 }
 0x2e4   : > { %3874 = vmatprep.subr.msk.bf16.mxu1 %vm1411_vm5, %v3426_v56 }
 0x2e8   : > { %3783 = vmatmul.mubr.msk.bf16.gmra.mxu0 %vm302_vm3, %v2504_v37 }
 0x2e9   : > { %3793 = vmatmul.mubr.msk.bf16.gmra.mxu1 %vm302_vm3, %v2606_v1  ;;  %3798 = vmatprep.mubr.msk.bf16.mxu0 %vm302_vm3, %v2705_v45 }
 0x2ea   : > { %3808 = vmatprep.mubr.msk.bf16.mxu1 %vm302_vm3, %v2807_v8 }
 0x2f0   : > { %3799 = vmatmul.mubr.msk.bf16.vlgmr.msra.gmra.mxu0 %vm302_vm3, %v2706_v48 }
 0x2f1   : > { %3809 = vmatmul.mubr.msk.bf16.vlgmr.msra.gmra.mxu1 %vm302_vm3, %v2808_v51  ;;  %3817 = vmatpush3.bf16.msra.mxu0 %v2928_v39 }
 0x2f2   : > { %3802 = vmatprep.mubr.msk.bf16.mxu0 %vm302_vm3, %v2707_v43  ;;  %3812 = vmatprep.mubr.msk.bf16.mxu1 %vm302_vm3, %v2809_v57 }
 0x2f3   : > { %3827 = vmatpush3.bf16.msra.mxu1 %v3030_v52  ;;  %3875 = vmatprep.subr.msk.bf16.mxu0 %vm1411_vm5, %v3431_v33 }
 0x2f8   : > { %3803 = vmatmul.mubr.msk.bf16.gmra.mxu0 %vm302_vm3, %v2708_v4 }
 0x2f9   : > { %3813 = vmatmul.mubr.msk.bf16.gmra.mxu1 %vm302_vm3, %v2810_v54  ;;  %3818 = vmatprep.mubr.msk.bf16.mxu0 %vm302_vm3, %v4509_v32 }
 0x2fa   : > { %3828 = vmatprep.mubr.msk.bf16.mxu1 %vm302_vm3, %v4507_v21 }
 0x300   : > { %3819 = vmatmul.mubr.msk.bf16.vlgmr.msra.gmra.mxu0 %vm302_vm3, %v4530_v36 }
 0x301   : > { %3829 = vmatmul.mubr.msk.bf16.vlgmr.msra.gmra.mxu1 %vm302_vm3, %v4528_v2  ;;  %3837 = vmatpush3.bf16.msra.mxu0 %v3132_v47 }
 0x302   : > { %3822 = vmatprep.mubr.msk.bf16.mxu0 %vm302_vm3, %v4543_v49  ;;  %3832 = vmatprep.mubr.msk.bf16.mxu1 %vm302_vm3, %v4541_v46 }
 0x308   : > { %3823 = vmatmul.mubr.msk.bf16.gmra.mxu0 %vm302_vm3, %v2912_v17 }
 0x309   : > { %3833 = vmatmul.mubr.msk.bf16.gmra.mxu1 %vm302_vm3, %v3014_v19  ;;  %3838 = vmatprep.mubr.msk.bf16.mxu0 %vm302_vm3, %v2502_v35 }
 0x310   : > { %3839 = vmatmul.mubr.msk.bf16.vlgmr.msra.gmra.mxu0 %vm302_vm3, %v2503_v44 }
 0x311   : > { %3842 = vmatprep.mubr.msk.bf16.mxu0 %vm302_vm3, %v2504_v37 }
 0x318   : > { %3843 = vmatmul.mubr.msk.bf16.gmra.mxu0 %vm302_vm3, %v3116_v7 }
 0x390   : > { %v3760_v25 = vpop.f32.mrf.mxu0 }
 0x391   : > { %v3770_v62 = vpop.f32.mrf.mxu1 }
 0x392   : > { %v2382_v15 = vpop.f32.mrf.mxu0  ;;  %v2471_v48 = vadd.f32 %v3770_v62, %v3760_v25 }
 0x393   : > { %v2462_v21 = vpop.f32.mrf.mxu1 }
 0x394   : > { %v3761_v32 = vpop.f32.mrf.mxu0  ;;  %v2463_v43 = vadd.f32 %v2462_v21, %v2382_v15 }
 0x395   : > { %v3771_v22 = vpop.f32.mrf.mxu1 }
 0x396   : > { %v2385_v23 = vpop.f32.mrf.mxu0  ;;  %v2474_v24 = vadd.f32 %v3771_v22, %v3761_v32 }
 0x397   : > { %v2465_v28 = vpop.f32.mrf.mxu1 }
 0x398   : > { %v3764_v27 = vpop.f32.mrf.mxu0  ;;  %v2466_v54 = vadd.f32 %v2465_v28, %v2385_v23 }
 0x399   : > { %v3774_v11 = vpop.f32.mrf.mxu1 }
 0x39a   : > { %v2398_v3 = vpop.f32.mrf.mxu0  ;;  %v2487_v17 = vadd.f32 %v3774_v11, %v3764_v27 }
 0x39b   : > { %v2478_v20 = vpop.f32.mrf.mxu1 }
 0x39c   : > { %v3765_v34 = vpop.f32.mrf.mxu0  ;;  %v2479_v25 = vadd.f32 %v2478_v20, %v2398_v3 }
 0x39d   : > { %v3775_v50 = vpop.f32.mrf.mxu1 }
 0x39e   : > { %v4609_v30 = vpop.f32.mrf.mxu0  ;;  %v2490_v21 = vadd.f32 %v3775_v50, %v3765_v34 }
 0x39f   : > { %v2481_v2 = vpop.f32.mrf.mxu1 }
 0x3a0   : > { %v3780_v36 = vpop.f32.mrf.mxu0  ;;  %v2482_v28 = vadd.f32 %v2481_v2, %v4609_v30 }
 0x3a1   : > { %v3790_v10 = vpop.f32.mrf.mxu1  ;;  %v2589_v52 = vadd.f32 %v3780_v36, %v2471_v48 }
 0x3a2   : > { %v2556_v12 = vpop.f32.mrf.mxu0 }
 0x3a3   : > { %v2658_v31 = vpop.f32.mrf.mxu1  ;;  %v2587_v5 = vadd.f32 %v2556_v12, %v2463_v43  ;;  %v2691_v47 = vadd.f32 %v3790_v10, %v2589_v52 }
 0x3a4   : > { %v3781_v38 = vpop.f32.mrf.mxu0 }
 0x3a5   : > { %v3791_v16 = vpop.f32.mrf.mxu1  ;;  %v2590_v0 = vadd.f32 %v3781_v38, %v2474_v24  ;;  %v2689_v6 = vadd.f32 %v2658_v31, %v2587_v5 }
 0x3a6   : > { %v2559_v46 = vpop.f32.mrf.mxu0 }
 0x3a7   : > { %v2661_v49 = vpop.f32.mrf.mxu1  ;;  %v2588_v7 = vadd.f32 %v2559_v46, %v2466_v54 }
 0x3a8   : > { %v3784_v53 = vpop.f32.mrf.mxu0 }
 0x3a9   : > { %v3794_v26 = vpop.f32.mrf.mxu1  ;;  %v2593_v62 = vadd.f32 %v3784_v53, %v2487_v17  ;;  %v2690_v22 = vadd.f32 %v2661_v49, %v2588_v7 }
 0x3aa   : > { %v2572_v14 = vpop.f32.mrf.mxu0 }
 0x3ab   : > { %v2674_v29 = vpop.f32.mrf.mxu1  ;;  %v2591_v36 = vadd.f32 %v2572_v14, %v2479_v25  ;;  %v2695_v27 = vadd.f32 %v3794_v26, %v2593_v62 }
 0x3ac   : > { %v3785_v13 = vpop.f32.mrf.mxu0 }
 0x3ad   : > { %v3795_v42 = vpop.f32.mrf.mxu1  ;;  %v2594_v11 = vadd.f32 %v3785_v13, %v2490_v21  ;;  %v2693_v3 = vadd.f32 %v2674_v29, %v2591_v36  ;;  %v3436_v29 = vld [vmem:[%s4658_s6] ss:$0 sm:$0xff] }
 0x3ae   : > { %v2575_v35 = vpop.f32.mrf.mxu0 }
 0x3af   : > { %v4611_v41 = vpop.f32.mrf.mxu1  ;;  %v2592_v20 = vadd.f32 %v2575_v35, %v2482_v28  ;;  %v2696_v14 = vadd.f32 %v3795_v42, %v2594_v11 }
 0x3b0   : > { %v3800_v55 = vpop.f32.mrf.mxu0 }
 0x3b1   : > { %v3810_v58 = vpop.f32.mrf.mxu1  ;;  %v2694_v2 = vadd.f32 %v4611_v41, %v2592_v20 }
 0x3b2   : > { %v2760_v44 = vpop.f32.mrf.mxu0 }
 0x3b3   : > { %v2862_v59 = vpop.f32.mrf.mxu1  ;;  %v2791_v15 = vadd.f32 %v2760_v44, %v2689_v6 }
 0x3b4   : > { %v3801_v60 = vpop.f32.mrf.mxu0 }
 0x3b5   : > { %v3811_v40 = vpop.f32.mrf.mxu1  ;;  %v2893_v31 = vadd.f32 %v2862_v59, %v2791_v15 }
 0x3b6   : > { %v2763_v56 = vpop.f32.mrf.mxu0 }
 0x3b7   : > { %v2865_v61 = vpop.f32.mrf.mxu1  ;;  %v2792_v38 = vadd.f32 %v2763_v56, %v2690_v22 }
 0x3b8   : > { %v3804_v9 = vpop.f32.mrf.mxu0 }
 0x3b9   : > { %v3814_v63 = vpop.f32.mrf.mxu1  ;;  %v2797_v53 = vadd.f32 %v3804_v9, %v2695_v27  ;;  %v2894_v44 = vadd.f32 %v2865_v61, %v2792_v38 }
 0x3ba   : > { %v2776_v37 = vpop.f32.mrf.mxu0 }
 0x3bb   : > { %v4613_v1 = vpop.f32.mrf.mxu1  ;;  %v2795_v49 = vadd.f32 %v2776_v37, %v2693_v3  ;;  %v2899_v26 = vadd.f32 %v3814_v63, %v2797_v53 }
 0x3bc   : > { %4703 = vst [vmem:[#allocation12_spill] sm:$0xff] %v4613_v1  ;;  %v3805_v45 = vpop.f32.mrf.mxu0 }
 0x3bd   : > { %v4615_v8 = vpop.f32.mrf.mxu1  ;;  %v2798_v13 = vadd.f32 %v3805_v45, %v2696_v14 }
 0x3be   : > { %4704 = vst [vmem:[#allocation13_spill] sm:$0xff] %v4615_v8  ;;  %v2779_v51 = vpop.f32.mrf.mxu0  ;;  %v2793_v8 = vadd.f32 %v3800_v55, %v2691_v47 }
 0x3bf   : > { %v4617_v39 = vpop.f32.mrf.mxu1 }
 0x3c0   : > { %4705 = vst [vmem:[#allocation14_spill] sm:$0xff] %v4617_v39  ;;  %v3820_v57 = vpop.f32.mrf.mxu0  ;;  %v2692_v39 = vadd.f32 %v3791_v16, %v2590_v0  ;;  %v2895_v12 = vadd.f32 %v3810_v58, %v2793_v8  ;;  %v2796_v8 = vadd.f32 %v2779_v51, %v2694_v2 }
 0x3c1   : > { %v3830_v33 = vpop.f32.mrf.mxu1 }
 0x3c2   : > { %v2964_v4 = vpop.f32.mrf.mxu0  ;;  %v2794_v23 = vadd.f32 %v3801_v60, %v2692_v39  ;;  %v2997_v46 = vadd.f32 %v3820_v57, %v2895_v12 }
 0x3c3   : > { %v3066_v18 = vpop.f32.mrf.mxu1  ;;  %v2995_v50 = vadd.f32 %v2964_v4, %v2893_v31  ;;  %v4706_v42 = vld [vmem:[#allocation12_spill] sm:$0xff] }
 0x3c4   : > { %v3821_v19 = vpop.f32.mrf.mxu0  ;;  %v2896_v34 = vadd.f32 %v3811_v40, %v2794_v23  ;;  %v3099_v60 = vadd.f32 %v3830_v33, %v2997_v46  ;;  %v2897_v37 = vadd.f32 %v4706_v42, %v2795_v49 }
 0x3c5   : > { %v3831_v48 = vpop.f32.mrf.mxu1  ;;  %v3097_v35 = vadd.f32 %v3066_v18, %v2995_v50  ;;  %v4707_v63 = vld [vmem:[#allocation13_spill] sm:$0xff] }
 0x3c6   : > { %v2967_v1 = vpop.f32.mrf.mxu0  ;;  %v2998_v30 = vadd.f32 %v3821_v19, %v2896_v34  ;;  %v2900_v45 = vadd.f32 %v4707_v63, %v2798_v13 }
 0x3c7   : > { %v3069_v16 = vpop.f32.mrf.mxu1  ;;  %v2996_v40 = vadd.f32 %v2967_v1, %v2894_v44  ;;  %v4708_v54 = vld [vmem:[#allocation14_spill] sm:$0xff] }
 0x3c8   : > { %v3824_v32 = vpop.f32.mrf.mxu0  ;;  %v3100_v43 = vadd.f32 %v3831_v48, %v2998_v30  ;;  %v2898_v47 = vadd.f32 %v4708_v54, %v2796_v8 }
 0x3c9   : > { %v3834_v59 = vpop.f32.mrf.mxu1  ;;  %v3001_v61 = vadd.f32 %v3824_v32, %v2899_v26  ;;  %v3098_v24 = vadd.f32 %v3069_v16, %v2996_v40 }
 0x3ca   : > { %v2980_v10 = vpop.f32.mrf.mxu0 }
 0x3cb   : > { %v2999_v57 = vadd.f32 %v2980_v10, %v2897_v37  ;;  %v3082_v33 = vpop.f32.mrf.mxu1  ;;  %v3103_v0 = vadd.f32 %v3834_v59, %v3001_v61 }
 0x3cc   : > { %v3825_v55 = vpop.f32.mrf.mxu0 }
 0x3cd   : > { %v3002_v18 = vadd.f32 %v3825_v55, %v2900_v45  ;;  %v3101_v25 = vadd.f32 %v3082_v33, %v2999_v57  ;;  %v3835_v62 = vpop.f32.mrf.mxu1 }
 0x3ce   : > { %v2983_v58 = vpop.f32.mrf.mxu0 }
 0x3cf   : > { %v3000_v21 = vadd.f32 %v2983_v58, %v2898_v47  ;;  %v3104_v12 = vadd.f32 %v3835_v62, %v3002_v18  ;;  %v3085_v11 = vpop.f32.mrf.mxu1 }
 0x3d0   : > { %v3840_v56 = vpop.f32.mrf.mxu0 }
 0x3d1   : > { %v3201_v9 = vadd.f32 %v3840_v56, %v3099_v60  ;;  %v3102_v31 = vadd.f32 %v3085_v11, %v3000_v21 }
 0x3d2   : > { %v3168_v39 = vpop.f32.mrf.mxu0 }
 0x3d3   : > { %v3216_v52 = vadd.f32 %v3436_v29, %v3201_v9  ;;  %v3199_v41 = vadd.f32 %v3168_v39, %v3097_v35 }
 0x3d4   : > { %v3841_v1 = vpop.f32.mrf.mxu0 }
 0x3d5   : > { %v3224_v5 = vmax.f32 %v3216_v52, 0.0  ;;  %v3214_v51 = vadd.f32 %v3436_v29, %v3199_v41  ;;  %v3202_v4 = vadd.f32 %v3841_v1, %v3100_v43 }
 0x3d6   : > { %v3171_v17 = vpop.f32.mrf.mxu0 }
 0x3d7   : > { %3232 = vst.msk [vmem:[%s4630_s9 + $0x10] sm:$0xff] %vm302_vm3, %v3224_v5  ;;  %v3222_v19 = vmax.f32 %v3214_v51, 0.0  ;;  %v3217_v6 = vadd.f32 %v3436_v29, %v3202_v4  ;;  %v3200_v7 = vadd.f32 %v3171_v17, %v3098_v24 }
 0x3d8   : > { %v3844_v15 = vpop.f32.mrf.mxu0 }
 0x3d9   : > { %3230 = vst.msk [vmem:[%s4630_s9] sm:$0xff] %vm302_vm3, %v3222_v19  ;;  %v3225_v36 = vmax.f32 %v3217_v6, 0.0  ;;  %v3215_v48 = vadd.f32 %v3436_v29, %v3200_v7  ;;  %v3205_v32 = vadd.f32 %v3844_v15, %v3103_v0 }
 0x3da   : > { %v3184_v22 = vpop.f32.mrf.mxu0 }
 0x3db   : > { %3233 = vst.msk [vmem:[%s4630_s9 + $0x18] sm:$0xff] %vm302_vm3, %v3225_v36  ;;  %v3223_v23 = vmax.f32 %v3215_v48, 0.0  ;;  %v3220_v28 = vadd.f32 %v3436_v29, %v3205_v32  ;;  %v3203_v27 = vadd.f32 %v3184_v22, %v3101_v25 }
 0x3dc   : > { %v3845_v10 = vpop.f32.mrf.mxu0 }
 0x3dd   : > { %3231 = vst.msk [vmem:[%s4630_s9 + $0x8] sm:$0xff] %vm302_vm3, %v3223_v23  ;;  %v3228_v38 = vmax.f32 %v3220_v28, 0.0  ;;  %v3218_v46 = vadd.f32 %v3436_v29, %v3203_v27  ;;  %v3206_v3 = vadd.f32 %v3845_v10, %v3104_v12 }
 0x3de   : > { %v3187_v20 = vpop.f32.mrf.mxu0 }
 0x3df   : > { %3236 = vst.msk [vmem:[%s4630_s9 + $0x30] sm:$0xff] %vm302_vm3, %v3228_v38  ;;  %v3226_v53 = vmax.f32 %v3218_v46, 0.0  ;;  %v3221_v16 = vadd.f32 %v3436_v29, %v3206_v3  ;;  %v3204_v55 = vadd.f32 %v3187_v20, %v3102_v31 }
 0x3e1   : > { %3234 = vst.msk [vmem:[%s4630_s9 + $0x20] sm:$0xff] %vm302_vm3, %v3226_v53  ;;  %v3229_v34 = vmax.f32 %v3221_v16, 0.0  ;;  %v3219_v50 = vadd.f32 %v3436_v29, %v3204_v55 }
 0x3e3   : > { %3237 = vst.msk [vmem:[%s4630_s9 + $0x38] sm:$0xff] %vm302_vm3, %v3229_v34  ;;  %v3227_v14 = vmax.f32 %v3219_v50, 0.0 }
 0x3e5   : > { %3235 = vst.msk [vmem:[%s4630_s9 + $0x28] sm:$0xff] %vm302_vm3, %v3227_v14 }
 0x3e6 PF: > { %s17_s24 = sadd.s32 1, %s3892_s24  }
 0x3e7   : > { %p14_p4 = scmp.ge.s32.totalorder %s17_s24, 4  }
 0x3e9   :  { %16 = sbr.rel (!%p14_p4) target bundleno = 1 (0x1), region = 106 }

</bundles_post_ra>
